<compile_context>
chip_gen: v6e
topology: v6e:2x2x1
jax: 0.10.0
libtpu: 0.0.40
codegen_flags: <defaults>
</compile_context>

<pallas_src>
import functools

import jax
import jax.numpy as jnp
from jax.experimental import pallas as pl
from jax.experimental.pallas import tpu as pltpu


def _round_up(x, m):
    return (x + m - 1) // m * m


def _conv_bn_relu_kernel(x_ref, w_ref, s_ref, o_ref, acc_ref, *rest,
                         wq, mrows, cin_p, fold_taps):
    """One grid step handles one (n, d, kd) triple.

    x_ref  : (1, 1, R, CIP)    bf16  padded depth plane d + kd, rows flattened
                                     as r = hy*(W+2) + wx (zero slack rows at end).
    w_ref  : (3, 9*CIP, Cp)    bf16  ALL 27 taps (BN scale folded in); constant
                                     index map -> resident in VMEM.
    s_ref  : (1, Cp)           f32   folded conv-bias + BN shift.
    o_ref  : (1, 1, mrows, Cp) bf16  output tile, written once at the last kd.
    acc_ref: (mrows, Cp)       f32   VMEM accumulator across the kd axis.
    rest   : ((mrows, 9*CIP) bf16 LHS scratch,) -- only when fold_taps.
    """
    kd = pl.program_id(2)
    last = pl.num_programs(2) - 1

    x = x_ref[0, 0]                                    # (R, CIP) bf16
    offs = tuple(kh * wq + kw for kh in range(3) for kw in range(3))

    if fold_taps:
        # Fold the 9 in-plane taps into the contraction dim: one MXU dot with
        # K = 9*CIP instead of 9 thin K=CIP dots.
        lhs_ref = rest[0]
        for j, off in enumerate(offs):
            lhs_ref[:, j * cin_p:(j + 1) * cin_p] = x[off:off + mrows, :]
        part = jnp.dot(lhs_ref[...], w_ref[kd],
                       preferred_element_type=jnp.float32)
    else:
        # CIP >= 128: K is already MXU-deep; slice the bf16 LHS per tap
        # (never a full-plane f32 product) and accumulate the 9 products.
        part = None
        for j, off in enumerate(offs):
            c = jnp.dot(x[off:off + mrows, :],
                        w_ref[kd, j * cin_p:(j + 1) * cin_p, :],
                        preferred_element_type=jnp.float32)
            part = c if part is None else part + c

    @pl.when(kd == 0)
    def _():
        acc_ref[...] = part                            # first depth tap: store

    @pl.when(jnp.logical_and(kd > 0, kd < last))
    def _():
        acc_ref[...] += part

    @pl.when(kd == last)
    def _():
        # fused conv-bias + BatchNorm(folded) + ReLU epilogue, single store
        o_ref[0, 0] = jnp.maximum(acc_ref[...] + part + s_ref[...],
                                  0.0).astype(o_ref.dtype)


def conv_block_3d(x, weight, bias, gamma, beta, running_mean, running_var,
                  eps=1e-5):
    """x: (N, Cin, D, H, W) f32 (PyTorch NCDHW); weight: (Cout, Cin, 3, 3, 3)."""
    N, Cin, D, H, W = x.shape
    Cout = weight.shape[0]

    Wq = W + 2
    Dp = D + 2
    CIP = _round_up(Cin, 8)                  # sublane-friendly contraction dim
    Cp = _round_up(Cout, 128)                # lane-dense output channels
    MROWS = _round_up(H * Wq, 8)             # output rows per (n, d) tile
    # Plane rows needed: largest tap window starts at 2*Wq+2 and spans MROWS.
    extra = MROWS - H * Wq + 2
    extra_h = -(-extra // Wq)                # ceil
    Hp = H + 2 + extra_h
    R = Hp * Wq                              # >= 2*Wq + 2 + MROWS  (zero slack)
    fold_taps = CIP < 128                    # fold (kh, kw) taps into K

    # --- glue: channels-last bf16, ONE pad, flatten (hy, wx) rows (~1x size) ---
    # NOTE: correctness relies on keeping Wq = W+2 columns per output row and
    # slicing the last two off below (row wrap-around only touches them).
    # TODO(synk): in a full network keep activations NDHWC bf16 across layers so
    # this transpose/pad and the final slice/transpose are not re-streamed.
    xl = jnp.transpose(x, (0, 2, 3, 4, 1)).astype(jnp.bfloat16)   # N,D,H,W,Cin
    xp = jnp.pad(xl, ((0, 0), (1, 1), (1, 1 + extra_h), (1, 1), (0, CIP - Cin)))
    xf = xp.reshape(N, Dp, R, CIP)                                 # N,Dp,R,CIP

    # --- fold conv bias + BN (inference) into weight scale & a shift vector ---
    scale = gamma / jnp.sqrt(running_var + eps)                    # (Cout,)
    shift = bias * scale + beta - running_mean * scale             # (Cout,)

    # weight[o, c, kd, kh, kw] -> wmat[kd, (kh*3+kw)*CIP + c, o] * scale[o]
    wt = jnp.transpose(weight, (2, 3, 4, 1, 0)) * scale            # 3,3,3,Cin,Cout
    wt = jnp.pad(wt, ((0, 0),) * 3 + ((0, CIP - Cin), (0, Cp - Cout)))
    wmat = wt.reshape(3, 9 * CIP, Cp).astype(jnp.bfloat16)

    svec = jnp.pad(shift, (0, Cp - Cout)).reshape(1, Cp).astype(jnp.float32)

    try:
        vmem_cap = pltpu.get_tpu_info().vmem_capacity_bytes
    except Exception:                         # conservative fallback (v7x-safe)
        vmem_cap = 64 * 1024 * 1024
    vmem_limit = max(32 * 1024 * 1024,
                     min(vmem_cap * 3 // 4, 100 * 1024 * 1024))

    cost = pl.CostEstimate(
        flops=2 * N * D * 3 * MROWS * 9 * CIP * Cp,
        transcendentals=0,
        bytes_accessed=(N * D * 3 * R * CIP * 2        # plane re-read per kd
                        + 3 * 9 * CIP * Cp * 2         # resident weights (once)
                        + Cp * 4                       # shift vector
                        + N * D * MROWS * Cp * 2))     # bf16 output writeback

    def build(fold):
        kernel = functools.partial(_conv_bn_relu_kernel, wq=Wq, mrows=MROWS,
                                   cin_p=CIP, fold_taps=fold)
        scratch = [pltpu.VMEM((MROWS, Cp), jnp.float32)]           # f32 acc
        if fold:
            scratch.append(pltpu.VMEM((MROWS, 9 * CIP), jnp.bfloat16))
        return pl.pallas_call(
            kernel,
            out_shape=jax.ShapeDtypeStruct((N, D, MROWS, Cp), jnp.bfloat16),
            grid_spec=pltpu.PrefetchScalarGridSpec(
                num_scalar_prefetch=0,
                grid=(N, D, 3),
                in_specs=[
                    # one padded depth plane, shifted by the depth tap kd
                    pl.BlockSpec((1, 1, R, CIP),
                                 lambda n, d, kd: (n, d + kd, 0, 0)),
                    # all 27 taps resident in VMEM (constant block index)
                    pl.BlockSpec((3, 9 * CIP, Cp), lambda n, d, kd: (0, 0, 0)),
                    # folded bias/BN shift (constant)
                    pl.BlockSpec((1, Cp), lambda n, d, kd: (0, 0)),
                ],
                out_specs=pl.BlockSpec((1, 1, MROWS, Cp),
                                       lambda n, d, kd: (n, d, 0, 0)),
                scratch_shapes=scratch,
            ),
            compiler_params=pltpu.CompilerParams(
                dimension_semantics=("parallel", "parallel", "arbitrary"),
                vmem_limit_bytes=vmem_limit),
            cost_estimate=cost,
        )

    try:
        out_flat = jax.block_until_ready(build(fold_taps)(xf, wmat, svec))
    except Exception:
        # Defensive: if the folded-K path fails to lower on this jax/libtpu
        # build, fall back to the per-tap path (still sliced bf16 LHS,
        # resident weights, scratch accumulator, fused epilogue).
        if not fold_taps:
            raise
        out_flat = jax.block_until_ready(build(False)(xf, wmat, svec))

    # drop padded rows / padded width columns / padded channels, back to NCDHW
    out = out_flat[:, :, :H * Wq, :].reshape(N, D, H, Wq, Cp)
    out = out[:, :, :, :W, :Cout]
    return jnp.transpose(out, (0, 4, 1, 2, 3)).astype(jnp.float32)


def _reference(x, weight, bias, gamma, beta, mean, var, eps=1e-5):
    # Same mixed-precision contract as the kernel: bf16 activations and
    # (BN-scale-folded) bf16 weights, f32 accumulation and f32 epilogue.
    scale = gamma / jnp.sqrt(var + eps)
    shift = bias * scale + beta - mean * scale
    xq = x.astype(jnp.bfloat16).astype(jnp.float32)
    wq = (weight * scale[:, None, None, None, None]
          ).astype(jnp.bfloat16).astype(jnp.float32)
    y = jax.lax.conv_general_dilated(
        xq, wq, window_strides=(1, 1, 1),
        padding=((1, 1), (1, 1), (1, 1)),
        dimension_numbers=("NCDHW", "OIDHW", "NCDHW"))
    y = y + shift[None, :, None, None, None]
    return jnp.maximum(y, 0.0)


if __name__ == "__main__":
    N, Cin, Cout, D, H, W = 2, 4, 8, 8, 8, 8

    key = jax.random.PRNGKey(0)
    kx, kw, kb, kg, kbt, km, kv = jax.random.split(key, 7)

    x = jax.random.normal(kx, (N, Cin, D, H, W), dtype=jnp.float32)
    weight = 0.1 * jax.random.normal(kw, (Cout, Cin, 3, 3, 3), dtype=jnp.float32)
    bias = 0.1 * jax.random.normal(kb, (Cout,), dtype=jnp.float32)
    gamma = 1.0 + 0.1 * jax.random.normal(kg, (Cout,), dtype=jnp.float32)
    beta = 0.1 * jax.random.normal(kbt, (Cout,), dtype=jnp.float32)
    running_mean = 0.1 * jax.random.normal(km, (Cout,), dtype=jnp.float32)
    running_var = jax.random.uniform(kv, (Cout,), dtype=jnp.float32,
                                     minval=0.5, maxval=1.5)

    out = conv_block_3d(x, weight, bias, gamma, beta,
                        running_mean, running_var)
    out = jax.block_until_ready(out)

    ref = _reference(x, weight, bias, gamma, beta, running_mean, running_var)
    assert out.shape == (N, Cout, D, H, W), out.shape

    # The kernel's HBM output is bf16 (perf review: halve writeback); allow
    # ~2 bf16 ulps of the largest output magnitude plus a small absolute slack.
    max_ref = float(jnp.max(jnp.abs(ref)))
    tol = 2.0 ** -7 * max_ref + 1e-3
    err = float(jnp.max(jnp.abs(out - ref)))
    assert err < tol, (err, tol)

    print("KERNEL_OK")
</pallas_src>

<mosaic_0001>
module attributes {stable_mosaic.version = 11 : i64} {
  func.func @_conv_bn_relu_kernel(%arg0: i32, %arg1: i32, %arg2: i32, %arg3: memref<1x1x110x8xbf16, #tpu.memory_space<vmem>>, %arg4: memref<3x72x128xbf16, #tpu.memory_space<vmem>>, %arg5: memref<1x128xf32, #tpu.memory_space<vmem>>, %arg6: memref<1x1x80x128xbf16, #tpu.memory_space<vmem>>, %arg7: memref<80x128xf32, #tpu.memory_space<vmem>>, %arg8: memref<80x72xbf16, #tpu.memory_space<vmem>>) attributes {dimension_semantics = [#tpu.dimension_semantics<parallel>, #tpu.dimension_semantics<parallel>, #tpu.dimension_semantics<arbitrary>], iteration_bounds = array<i64: 2, 8, 3>, scalar_prefetch = 0 : i64, scratch_operands = 2 : i64, tpu.core_type = #tpu.core_type<tc>, window_params = [{transform_indices = @transform_0, window_bounds = array<i64: 1, 1, 110, 8>}, {pipeline_mode = #tpu.pipeline_mode<synchronous>, transform_indices = @transform_1, window_bounds = array<i64: 3, 72, 128>}, {pipeline_mode = #tpu.pipeline_mode<synchronous>, transform_indices = @transform_2, window_bounds = array<i64: 1, 128>}, {transform_indices = @transform_3, window_bounds = array<i64: 1, 1, 80, 128>}]} {
    %c0 = arith.constant 0 : index
    %c0_0 = arith.constant 0 : index
    %c0_1 = arith.constant 0 : index
    %c0_2 = arith.constant 0 : index
    %0 = vector.load %arg3[%c0, %c0_0, %c0_1, %c0_2] : memref<1x1x110x8xbf16, #tpu.memory_space<vmem>>, vector<1x1x110x8xbf16>
    %1 = vector.shape_cast %0 : vector<1x1x110x8xbf16> to vector<110x8xbf16>
    %2 = vector.extract_strided_slice %1 {offsets = [0, 0], sizes = [80, 8], strides = [1, 1]} : vector<110x8xbf16> to vector<80x8xbf16>
    %c0_3 = arith.constant 0 : index
    %c0_4 = arith.constant 0 : index
    %3 = vector.load %arg8[%c0_3, %c0_4] : memref<80x72xbf16, #tpu.memory_space<vmem>>, vector<80x8xbf16>
    tpu.vector_store %arg8[%c0_3, %c0_4], %2 {strides = array<i32>} : memref<80x72xbf16, #tpu.memory_space<vmem>>, vector<80x8xbf16>,
    %4 = vector.extract_strided_slice %1 {offsets = [1, 0], sizes = [80, 8], strides = [1, 1]} : vector<110x8xbf16> to vector<80x8xbf16>
    %c0_5 = arith.constant 0 : index
    %c8 = arith.constant 8 : index
    %5 = vector.load %arg8[%c0_5, %c8] : memref<80x72xbf16, #tpu.memory_space<vmem>>, vector<80x8xbf16>
    tpu.vector_store %arg8[%c0_5, %c8], %4 {strides = array<i32>} : memref<80x72xbf16, #tpu.memory_space<vmem>>, vector<80x8xbf16>,
    %6 = vector.extract_strided_slice %1 {offsets = [2, 0], sizes = [80, 8], strides = [1, 1]} : vector<110x8xbf16> to vector<80x8xbf16>
    %c0_6 = arith.constant 0 : index
    %c16 = arith.constant 16 : index
    %7 = vector.load %arg8[%c0_6, %c16] : memref<80x72xbf16, #tpu.memory_space<vmem>>, vector<80x8xbf16>
    tpu.vector_store %arg8[%c0_6, %c16], %6 {strides = array<i32>} : memref<80x72xbf16, #tpu.memory_space<vmem>>, vector<80x8xbf16>,
    %8 = vector.extract_strided_slice %1 {offsets = [10, 0], sizes = [80, 8], strides = [1, 1]} : vector<110x8xbf16> to vector<80x8xbf16>
    %c0_7 = arith.constant 0 : index
    %c24 = arith.constant 24 : index
    %9 = vector.load %arg8[%c0_7, %c24] : memref<80x72xbf16, #tpu.memory_space<vmem>>, vector<80x8xbf16>
    tpu.vector_store %arg8[%c0_7, %c24], %8 {strides = array<i32>} : memref<80x72xbf16, #tpu.memory_space<vmem>>, vector<80x8xbf16>,
    %10 = vector.extract_strided_slice %1 {offsets = [11, 0], sizes = [80, 8], strides = [1, 1]} : vector<110x8xbf16> to vector<80x8xbf16>
    %c0_8 = arith.constant 0 : index
    %c32 = arith.constant 32 : index
    %11 = vector.load %arg8[%c0_8, %c32] : memref<80x72xbf16, #tpu.memory_space<vmem>>, vector<80x8xbf16>
    tpu.vector_store %arg8[%c0_8, %c32], %10 {strides = array<i32>} : memref<80x72xbf16, #tpu.memory_space<vmem>>, vector<80x8xbf16>,
    %12 = vector.extract_strided_slice %1 {offsets = [12, 0], sizes = [80, 8], strides = [1, 1]} : vector<110x8xbf16> to vector<80x8xbf16>
    %c0_9 = arith.constant 0 : index
    %c40 = arith.constant 40 : index
    %13 = vector.load %arg8[%c0_9, %c40] : memref<80x72xbf16, #tpu.memory_space<vmem>>, vector<80x8xbf16>
    tpu.vector_store %arg8[%c0_9, %c40], %12 {strides = array<i32>} : memref<80x72xbf16, #tpu.memory_space<vmem>>, vector<80x8xbf16>,
    %14 = vector.extract_strided_slice %1 {offsets = [20, 0], sizes = [80, 8], strides = [1, 1]} : vector<110x8xbf16> to vector<80x8xbf16>
    %c0_10 = arith.constant 0 : index
    %c48 = arith.constant 48 : index
    %15 = vector.load %arg8[%c0_10, %c48] : memref<80x72xbf16, #tpu.memory_space<vmem>>, vector<80x8xbf16>
    tpu.vector_store %arg8[%c0_10, %c48], %14 {strides = array<i32>} : memref<80x72xbf16, #tpu.memory_space<vmem>>, vector<80x8xbf16>,
    %16 = vector.extract_strided_slice %1 {offsets = [21, 0], sizes = [80, 8], strides = [1, 1]} : vector<110x8xbf16> to vector<80x8xbf16>
    %c0_11 = arith.constant 0 : index
    %c56 = arith.constant 56 : index
    %17 = vector.load %arg8[%c0_11, %c56] : memref<80x72xbf16, #tpu.memory_space<vmem>>, vector<80x8xbf16>
    tpu.vector_store %arg8[%c0_11, %c56], %16 {strides = array<i32>} : memref<80x72xbf16, #tpu.memory_space<vmem>>, vector<80x8xbf16>,
    %18 = vector.extract_strided_slice %1 {offsets = [22, 0], sizes = [80, 8], strides = [1, 1]} : vector<110x8xbf16> to vector<80x8xbf16>
    %c0_12 = arith.constant 0 : index
    %c64 = arith.constant 64 : index
    %19 = vector.load %arg8[%c0_12, %c64] : memref<80x72xbf16, #tpu.memory_space<vmem>>, vector<80x8xbf16>
    tpu.vector_store %arg8[%c0_12, %c64], %18 {strides = array<i32>} : memref<80x72xbf16, #tpu.memory_space<vmem>>, vector<80x8xbf16>,
    %c0_13 = arith.constant 0 : index
    %c0_14 = arith.constant 0 : index
    %20 = vector.load %arg8[%c0_13, %c0_14] : memref<80x72xbf16, #tpu.memory_space<vmem>>, vector<80x72xbf16>
    %21 = arith.index_cast %arg2 : i32 to index
    %c0_15 = arith.constant 0 : index
    %c0_16 = arith.constant 0 : index
    %22 = vector.load %arg4[%21, %c0_15, %c0_16] : memref<3x72x128xbf16, #tpu.memory_space<vmem>>, vector<1x72x128xbf16>
    %23 = vector.shape_cast %22 : vector<1x72x128xbf16> to vector<72x128xbf16>
    %cst = arith.constant dense<0.000000e+00> : vector<80x128xf32>
    %24 = tpu.matmul %20, %23, %cst {dimension_numbers = #tpu.dot_dimension_numbers<[1], [0], [0], [1], [0, 0, 1, 1], [], []>} : vector<80x72xbf16>, vector<72x128xbf16>, vector<80x128xf32> -> vector<80x128xf32>
    %c0_i32 = arith.constant 0 : i32
    %25 = arith.cmpi eq, %arg2, %c0_i32 : i32
    %26 = arith.extui %25 : i1 to i32
    %c0_i32_17 = arith.constant 0 : i32
    %27 = arith.cmpi ne, %26, %c0_i32_17 : i32
    scf.if %27 {
      %c0_22 = arith.constant 0 : index
      %c0_23 = arith.constant 0 : index
      %36 = vector.load %arg7[%c0_22, %c0_23] : memref<80x128xf32, #tpu.memory_space<vmem>>, vector<80x128xf32>
      tpu.vector_store %arg7[%c0_22, %c0_23], %24 {strides = array<i32>} : memref<80x128xf32, #tpu.memory_space<vmem>>, vector<80x128xf32>,
    } else {
    }
    %c0_i32_18 = arith.constant 0 : i32
    %28 = arith.cmpi sgt, %arg2, %c0_i32_18 : i32
    %c2_i32 = arith.constant 2 : i32
    %29 = arith.cmpi slt, %arg2, %c2_i32 : i32
    %30 = arith.andi %28, %29 : i1
    %31 = arith.extui %30 : i1 to i32
    %c0_i32_19 = arith.constant 0 : i32
    %32 = arith.cmpi ne, %31, %c0_i32_19 : i32
    scf.if %32 {
      %c0_22 = arith.constant 0 : index
      %c0_23 = arith.constant 0 : index
      %36 = vector.load %arg7[%c0_22, %c0_23] : memref<80x128xf32, #tpu.memory_space<vmem>>, vector<80x128xf32>
      %37 = arith.addf %36, %24 : vector<80x128xf32>
      %c0_24 = arith.constant 0 : index
      %c0_25 = arith.constant 0 : index
      %38 = vector.load %arg7[%c0_24, %c0_25] : memref<80x128xf32, #tpu.memory_space<vmem>>, vector<80x128xf32>
      tpu.vector_store %arg7[%c0_24, %c0_25], %37 {strides = array<i32>} : memref<80x128xf32, #tpu.memory_space<vmem>>, vector<80x128xf32>,
    } else {
    }
    %c2_i32_20 = arith.constant 2 : i32
    %33 = arith.cmpi eq, %arg2, %c2_i32_20 : i32
    %34 = arith.extui %33 : i1 to i32
    %c0_i32_21 = arith.constant 0 : i32
    %35 = arith.cmpi ne, %34, %c0_i32_21 : i32
    scf.if %35 {
      %c0_22 = arith.constant 0 : index
      %c0_23 = arith.constant 0 : index
      %36 = vector.load %arg7[%c0_22, %c0_23] : memref<80x128xf32, #tpu.memory_space<vmem>>, vector<80x128xf32>
      %37 = arith.addf %36, %24 : vector<80x128xf32>
      %c0_24 = arith.constant 0 : index
      %c0_25 = arith.constant 0 : index
      %38 = vector.load %arg5[%c0_24, %c0_25] : memref<1x128xf32, #tpu.memory_space<vmem>>, vector<1x128xf32>
      %39 = vector.broadcast %38 : vector<1x128xf32> to vector<80x128xf32>
      %40 = arith.addf %37, %39 : vector<80x128xf32>
      %cst_26 = arith.constant 0.000000e+00 : f32
      %41 = vector.broadcast %cst_26 : f32 to vector<80x128xf32>
      %42 = arith.maximumf %40, %41 : vector<80x128xf32>
      %43 = arith.truncf %42 : vector<80x128xf32> to vector<80x128xbf16>
      %c0_27 = arith.constant 0 : index
      %c0_28 = arith.constant 0 : index
      %c0_29 = arith.constant 0 : index
      %c0_30 = arith.constant 0 : index
      %44 = vector.load %arg6[%c0_27, %c0_28, %c0_29, %c0_30] : memref<1x1x80x128xbf16, #tpu.memory_space<vmem>>, vector<1x1x80x128xbf16>
      %45 = vector.shape_cast %44 : vector<1x1x80x128xbf16> to vector<80x128xbf16>
      %46 = vector.shape_cast %43 : vector<80x128xbf16> to vector<1x1x80x128xbf16>
      tpu.vector_store %arg6[%c0_27, %c0_28, %c0_29, %c0_30], %46 {strides = array<i32>} : memref<1x1x80x128xbf16, #tpu.memory_space<vmem>>, vector<1x1x80x128xbf16>,
    } else {
    }
    return
  }
  func.func @transform_0(%arg0: i32, %arg1: i32, %arg2: i32) -> (i32, i32, i32, i32) {
    %0 = arith.addi %arg1, %arg2 : i32
    %c0_i32 = arith.constant 0 : i32
    %c0_i32_0 = arith.constant 0 : i32
    %c0_i32_1 = arith.constant 0 : i32
    return %arg0, %0, %c0_i32, %c0_i32_0 : i32, i32, i32, i32
  }
  func.func @transform_1(%arg0: i32, %arg1: i32, %arg2: i32) -> (i32, i32, i32) {
    %c0_i32 = arith.constant 0 : i32
    %c0_i32_0 = arith.constant 0 : i32
    %c0_i32_1 = arith.constant 0 : i32
    %c0_i32_2 = arith.constant 0 : i32
    return %c0_i32, %c0_i32_0, %c0_i32_1 : i32, i32, i32
  }
  func.func @transform_2(%arg0: i32, %arg1: i32, %arg2: i32) -> (i32, i32) {
    %c0_i32 = arith.constant 0 : i32
    %c0_i32_0 = arith.constant 0 : i32
    %c0_i32_1 = arith.constant 0 : i32
    return %c0_i32, %c0_i32_0 : i32, i32
  }
  func.func @transform_3(%arg0: i32, %arg1: i32, %arg2: i32) -> (i32, i32, i32, i32) {
    %c0_i32 = arith.constant 0 : i32
    %c0_i32_0 = arith.constant 0 : i32
    %c0_i32_1 = arith.constant 0 : i32
    return %arg0, %arg1, %c0_i32, %c0_i32_0 : i32, i32, i32, i32
  }
}

module attributes {stable_mosaic.version = 11 : i64} {
  func.func @_conv_bn_relu_kernel(%arg0: i32, %arg1: i32, %arg2: i32, %arg3: memref<1x1x110x8xbf16, #tpu.memory_space<vmem>>, %arg4: memref<3x72x128xbf16, #tpu.memory_space<vmem>>, %arg5: memref<1x128xf32, #tpu.memory_space<vmem>>, %arg6: memref<1x1x80x128xbf16, #tpu.memory_space<vmem>>, %arg7: memref<80x128xf32, #tpu.memory_space<vmem>>) attributes {dimension_semantics = [#tpu.dimension_semantics<parallel>, #tpu.dimension_semantics<parallel>, #tpu.dimension_semantics<arbitrary>], iteration_bounds = array<i64: 2, 8, 3>, scalar_prefetch = 0 : i64, scratch_operands = 1 : i64, tpu.core_type = #tpu.core_type<tc>, window_params = [{transform_indices = @transform_0, window_bounds = array<i64: 1, 1, 110, 8>}, {pipeline_mode = #tpu.pipeline_mode<synchronous>, transform_indices = @transform_1, window_bounds = array<i64: 3, 72, 128>}, {pipeline_mode = #tpu.pipeline_mode<synchronous>, transform_indices = @transform_2, window_bounds = array<i64: 1, 128>}, {transform_indices = @transform_3, window_bounds = array<i64: 1, 1, 80, 128>}]} {
    %c0 = arith.constant 0 : index
    %c0_0 = arith.constant 0 : index
    %c0_1 = arith.constant 0 : index
    %c0_2 = arith.constant 0 : index
    %0 = vector.load %arg3[%c0, %c0_0, %c0_1, %c0_2] : memref<1x1x110x8xbf16, #tpu.memory_space<vmem>>, vector<1x1x110x8xbf16>
    %1 = vector.shape_cast %0 : vector<1x1x110x8xbf16> to vector<110x8xbf16>
    %2 = vector.extract_strided_slice %1 {offsets = [0, 0], sizes = [80, 8], strides = [1, 1]} : vector<110x8xbf16> to vector<80x8xbf16>
    %3 = arith.index_cast %arg2 : i32 to index
    %c0_3 = arith.constant 0 : index
    %c0_4 = arith.constant 0 : index
    %4 = vector.load %arg4[%3, %c0_3, %c0_4] : memref<3x72x128xbf16, #tpu.memory_space<vmem>>, vector<1x8x128xbf16>
    %5 = vector.shape_cast %4 : vector<1x8x128xbf16> to vector<8x128xbf16>
    %cst = arith.constant dense<0.000000e+00> : vector<80x128xf32>
    %6 = tpu.matmul %2, %5, %cst {dimension_numbers = #tpu.dot_dimension_numbers<[1], [0], [0], [1], [0, 0, 1, 1], [], []>} : vector<80x8xbf16>, vector<8x128xbf16>, vector<80x128xf32> -> vector<80x128xf32>
    %7 = vector.extract_strided_slice %1 {offsets = [1, 0], sizes = [80, 8], strides = [1, 1]} : vector<110x8xbf16> to vector<80x8xbf16>
    %8 = arith.index_cast %arg2 : i32 to index
    %c8 = arith.constant 8 : index
    %c0_5 = arith.constant 0 : index
    %9 = vector.load %arg4[%8, %c8, %c0_5] : memref<3x72x128xbf16, #tpu.memory_space<vmem>>, vector<1x8x128xbf16>
    %10 = vector.shape_cast %9 : vector<1x8x128xbf16> to vector<8x128xbf16>
    %cst_6 = arith.constant dense<0.000000e+00> : vector<80x128xf32>
    %11 = tpu.matmul %7, %10, %cst_6 {dimension_numbers = #tpu.dot_dimension_numbers<[1], [0], [0], [1], [0, 0, 1, 1], [], []>} : vector<80x8xbf16>, vector<8x128xbf16>, vector<80x128xf32> -> vector<80x128xf32>
    %12 = arith.addf %6, %11 : vector<80x128xf32>
    %13 = vector.extract_strided_slice %1 {offsets = [2, 0], sizes = [80, 8], strides = [1, 1]} : vector<110x8xbf16> to vector<80x8xbf16>
    %14 = arith.index_cast %arg2 : i32 to index
    %c16 = arith.constant 16 : index
    %c0_7 = arith.constant 0 : index
    %15 = vector.load %arg4[%14, %c16, %c0_7] : memref<3x72x128xbf16, #tpu.memory_space<vmem>>, vector<1x8x128xbf16>
    %16 = vector.shape_cast %15 : vector<1x8x128xbf16> to vector<8x128xbf16>
    %cst_8 = arith.constant dense<0.000000e+00> : vector<80x128xf32>
    %17 = tpu.matmul %13, %16, %cst_8 {dimension_numbers = #tpu.dot_dimension_numbers<[1], [0], [0], [1], [0, 0, 1, 1], [], []>} : vector<80x8xbf16>, vector<8x128xbf16>, vector<80x128xf32> -> vector<80x128xf32>
    %18 = arith.addf %12, %17 : vector<80x128xf32>
    %19 = vector.extract_strided_slice %1 {offsets = [10, 0], sizes = [80, 8], strides = [1, 1]} : vector<110x8xbf16> to vector<80x8xbf16>
    %20 = arith.index_cast %arg2 : i32 to index
    %c24 = arith.constant 24 : index
    %c0_9 = arith.constant 0 : index
    %21 = vector.load %arg4[%20, %c24, %c0_9] : memref<3x72x128xbf16, #tpu.memory_space<vmem>>, vector<1x8x128xbf16>
    %22 = vector.shape_cast %21 : vector<1x8x128xbf16> to vector<8x128xbf16>
    %cst_10 = arith.constant dense<0.000000e+00> : vector<80x128xf32>
    %23 = tpu.matmul %19, %22, %cst_10 {dimension_numbers = #tpu.dot_dimension_numbers<[1], [0], [0], [1], [0, 0, 1, 1], [], []>} : vector<80x8xbf16>, vector<8x128xbf16>, vector<80x128xf32> -> vector<80x128xf32>
    %24 = arith.addf %18, %23 : vector<80x128xf32>
    %25 = vector.extract_strided_slice %1 {offsets = [11, 0], sizes = [80, 8], strides = [1, 1]} : vector<110x8xbf16> to vector<80x8xbf16>
    %26 = arith.index_cast %arg2 : i32 to index
    %c32 = arith.constant 32 : index
    %c0_11 = arith.constant 0 : index
    %27 = vector.load %arg4[%26, %c32, %c0_11] : memref<3x72x128xbf16, #tpu.memory_space<vmem>>, vector<1x8x128xbf16>
    %28 = vector.shape_cast %27 : vector<1x8x128xbf16> to vector<8x128xbf16>
    %cst_12 = arith.constant dense<0.000000e+00> : vector<80x128xf32>
    %29 = tpu.matmul %25, %28, %cst_12 {dimension_numbers = #tpu.dot_dimension_numbers<[1], [0], [0], [1], [0, 0, 1, 1], [], []>} : vector<80x8xbf16>, vector<8x128xbf16>, vector<80x128xf32> -> vector<80x128xf32>
    %30 = arith.addf %24, %29 : vector<80x128xf32>
    %31 = vector.extract_strided_slice %1 {offsets = [12, 0], sizes = [80, 8], strides = [1, 1]} : vector<110x8xbf16> to vector<80x8xbf16>
    %32 = arith.index_cast %arg2 : i32 to index
    %c40 = arith.constant 40 : index
    %c0_13 = arith.constant 0 : index
    %33 = vector.load %arg4[%32, %c40, %c0_13] : memref<3x72x128xbf16, #tpu.memory_space<vmem>>, vector<1x8x128xbf16>
    %34 = vector.shape_cast %33 : vector<1x8x128xbf16> to vector<8x128xbf16>
    %cst_14 = arith.constant dense<0.000000e+00> : vector<80x128xf32>
    %35 = tpu.matmul %31, %34, %cst_14 {dimension_numbers = #tpu.dot_dimension_numbers<[1], [0], [0], [1], [0, 0, 1, 1], [], []>} : vector<80x8xbf16>, vector<8x128xbf16>, vector<80x128xf32> -> vector<80x128xf32>
    %36 = arith.addf %30, %35 : vector<80x128xf32>
    %37 = vector.extract_strided_slice %1 {offsets = [20, 0], sizes = [80, 8], strides = [1, 1]} : vector<110x8xbf16> to vector<80x8xbf16>
    %38 = arith.index_cast %arg2 : i32 to index
    %c48 = arith.constant 48 : index
    %c0_15 = arith.constant 0 : index
    %39 = vector.load %arg4[%38, %c48, %c0_15] : memref<3x72x128xbf16, #tpu.memory_space<vmem>>, vector<1x8x128xbf16>
    %40 = vector.shape_cast %39 : vector<1x8x128xbf16> to vector<8x128xbf16>
    %cst_16 = arith.constant dense<0.000000e+00> : vector<80x128xf32>
    %41 = tpu.matmul %37, %40, %cst_16 {dimension_numbers = #tpu.dot_dimension_numbers<[1], [0], [0], [1], [0, 0, 1, 1], [], []>} : vector<80x8xbf16>, vector<8x128xbf16>, vector<80x128xf32> -> vector<80x128xf32>
    %42 = arith.addf %36, %41 : vector<80x128xf32>
    %43 = vector.extract_strided_slice %1 {offsets = [21, 0], sizes = [80, 8], strides = [1, 1]} : vector<110x8xbf16> to vector<80x8xbf16>
    %44 = arith.index_cast %arg2 : i32 to index
    %c56 = arith.constant 56 : index
    %c0_17 = arith.constant 0 : index
    %45 = vector.load %arg4[%44, %c56, %c0_17] : memref<3x72x128xbf16, #tpu.memory_space<vmem>>, vector<1x8x128xbf16>
    %46 = vector.shape_cast %45 : vector<1x8x128xbf16> to vector<8x128xbf16>
    %cst_18 = arith.constant dense<0.000000e+00> : vector<80x128xf32>
    %47 = tpu.matmul %43, %46, %cst_18 {dimension_numbers = #tpu.dot_dimension_numbers<[1], [0], [0], [1], [0, 0, 1, 1], [], []>} : vector<80x8xbf16>, vector<8x128xbf16>, vector<80x128xf32> -> vector<80x128xf32>
    %48 = arith.addf %42, %47 : vector<80x128xf32>
    %49 = vector.extract_strided_slice %1 {offsets = [22, 0], sizes = [80, 8], strides = [1, 1]} : vector<110x8xbf16> to vector<80x8xbf16>
    %50 = arith.index_cast %arg2 : i32 to index
    %c64 = arith.constant 64 : index
    %c0_19 = arith.constant 0 : index
    %51 = vector.load %arg4[%50, %c64, %c0_19] : memref<3x72x128xbf16, #tpu.memory_space<vmem>>, vector<1x8x128xbf16>
    %52 = vector.shape_cast %51 : vector<1x8x128xbf16> to vector<8x128xbf16>
    %cst_20 = arith.constant dense<0.000000e+00> : vector<80x128xf32>
    %53 = tpu.matmul %49, %52, %cst_20 {dimension_numbers = #tpu.dot_dimension_numbers<[1], [0], [0], [1], [0, 0, 1, 1], [], []>} : vector<80x8xbf16>, vector<8x128xbf16>, vector<80x128xf32> -> vector<80x128xf32>
    %54 = arith.addf %48, %53 : vector<80x128xf32>
    %c0_i32 = arith.constant 0 : i32
    %55 = arith.cmpi eq, %arg2, %c0_i32 : i32
    %56 = arith.extui %55 : i1 to i32
    %c0_i32_21 = arith.constant 0 : i32
    %57 = arith.cmpi ne, %56, %c0_i32_21 : i32
    scf.if %57 {
      %c0_26 = arith.constant 0 : index
      %c0_27 = arith.constant 0 : index
      %66 = vector.load %arg7[%c0_26, %c0_27] : memref<80x128xf32, #tpu.memory_space<vmem>>, vector<80x128xf32>
      tpu.vector_store %arg7[%c0_26, %c0_27], %54 {strides = array<i32>} : memref<80x128xf32, #tpu.memory_space<vmem>>, vector<80x128xf32>,
    } else {
    }
    %c0_i32_22 = arith.constant 0 : i32
    %58 = arith.cmpi sgt, %arg2, %c0_i32_22 : i32
    %c2_i32 = arith.constant 2 : i32
    %59 = arith.cmpi slt, %arg2, %c2_i32 : i32
    %60 = arith.andi %58, %59 : i1
    %61 = arith.extui %60 : i1 to i32
    %c0_i32_23 = arith.constant 0 : i32
    %62 = arith.cmpi ne, %61, %c0_i32_23 : i32
    scf.if %62 {
      %c0_26 = arith.constant 0 : index
      %c0_27 = arith.constant 0 : index
      %66 = vector.load %arg7[%c0_26, %c0_27] : memref<80x128xf32, #tpu.memory_space<vmem>>, vector<80x128xf32>
      %67 = arith.addf %66, %54 : vector<80x128xf32>
      %c0_28 = arith.constant 0 : index
      %c0_29 = arith.constant 0 : index
      %68 = vector.load %arg7[%c0_28, %c0_29] : memref<80x128xf32, #tpu.memory_space<vmem>>, vector<80x128xf32>
      tpu.vector_store %arg7[%c0_28, %c0_29], %67 {strides = array<i32>} : memref<80x128xf32, #tpu.memory_space<vmem>>, vector<80x128xf32>,
    } else {
    }
    %c2_i32_24 = arith.constant 2 : i32
    %63 = arith.cmpi eq, %arg2, %c2_i32_24 : i32
    %64 = arith.extui %63 : i1 to i32
    %c0_i32_25 = arith.constant 0 : i32
    %65 = arith.cmpi ne, %64, %c0_i32_25 : i32
    scf.if %65 {
      %c0_26 = arith.constant 0 : index
      %c0_27 = arith.constant 0 : index
      %66 = vector.load %arg7[%c0_26, %c0_27] : memref<80x128xf32, #tpu.memory_space<vmem>>, vector<80x128xf32>
      %67 = arith.addf %66, %54 : vector<80x128xf32>
      %c0_28 = arith.constant 0 : index
      %c0_29 = arith.constant 0 : index
      %68 = vector.load %arg5[%c0_28, %c0_29] : memref<1x128xf32, #tpu.memory_space<vmem>>, vector<1x128xf32>
      %69 = vector.broadcast %68 : vector<1x128xf32> to vector<80x128xf32>
      %70 = arith.addf %67, %69 : vector<80x128xf32>
      %cst_30 = arith.constant 0.000000e+00 : f32
      %71 = vector.broadcast %cst_30 : f32 to vector<80x128xf32>
      %72 = arith.maximumf %70, %71 : vector<80x128xf32>
      %73 = arith.truncf %72 : vector<80x128xf32> to vector<80x128xbf16>
      %c0_31 = arith.constant 0 : index
      %c0_32 = arith.constant 0 : index
      %c0_33 = arith.constant 0 : index
      %c0_34 = arith.constant 0 : index
      %74 = vector.load %arg6[%c0_31, %c0_32, %c0_33, %c0_34] : memref<1x1x80x128xbf16, #tpu.memory_space<vmem>>, vector<1x1x80x128xbf16>
      %75 = vector.shape_cast %74 : vector<1x1x80x128xbf16> to vector<80x128xbf16>
      %76 = vector.shape_cast %73 : vector<80x128xbf16> to vector<1x1x80x128xbf16>
      tpu.vector_store %arg6[%c0_31, %c0_32, %c0_33, %c0_34], %76 {strides = array<i32>} : memref<1x1x80x128xbf16, #tpu.memory_space<vmem>>, vector<1x1x80x128xbf16>,
    } else {
    }
    return
  }
  func.func @transform_0(%arg0: i32, %arg1: i32, %arg2: i32) -> (i32, i32, i32, i32) {
    %0 = arith.addi %arg1, %arg2 : i32
    %c0_i32 = arith.constant 0 : i32
    %c0_i32_0 = arith.constant 0 : i32
    %c0_i32_1 = arith.constant 0 : i32
    return %arg0, %0, %c0_i32, %c0_i32_0 : i32, i32, i32, i32
  }
  func.func @transform_1(%arg0: i32, %arg1: i32, %arg2: i32) -> (i32, i32, i32) {
    %c0_i32 = arith.constant 0 : i32
    %c0_i32_0 = arith.constant 0 : i32
    %c0_i32_1 = arith.constant 0 : i32
    %c0_i32_2 = arith.constant 0 : i32
    return %c0_i32, %c0_i32_0, %c0_i32_1 : i32, i32, i32
  }
  func.func @transform_2(%arg0: i32, %arg1: i32, %arg2: i32) -> (i32, i32) {
    %c0_i32 = arith.constant 0 : i32
    %c0_i32_0 = arith.constant 0 : i32
    %c0_i32_1 = arith.constant 0 : i32
    return %c0_i32, %c0_i32_0 : i32, i32
  }
  func.func @transform_3(%arg0: i32, %arg1: i32, %arg2: i32) -> (i32, i32, i32, i32) {
    %c0_i32 = arith.constant 0 : i32
    %c0_i32_0 = arith.constant 0 : i32
    %c0_i32_1 = arith.constant 0 : i32
    return %arg0, %arg1, %c0_i32, %c0_i32_0 : i32, i32, i32, i32
  }
}

</mosaic_0001>

<bundles_post_ra>
// kernel: tpu_custom_call.1
= control target key start
LH: loop header
LB: loop body
LE: loop exit
PB: predicated region body
PF: predicated region fallthrough
CT: control target
= control target key end

     0   :  { %8 = vsyncpa [#allocation5], 0  ;;  %s2736_s0 = inlined_call_operand.vmem [shape: bf16[2,10,110,8], index: 0, kind: input, shape index: {}]   ;;  %s2737_s1 = inlined_call_operand.vmem [shape: bf16[3,72,128], index: 1, kind: input, shape index: {}]   ;;  %s2738_s2 = inlined_call_operand.vmem [shape: f32[1,128], index: 2, kind: input, shape index: {}]   ;;  %s2739_s3 = inlined_call_operand.hbm [shape: bf16[2,8,80,128], index: 3, kind: output, shape index: {}]  }
   0x1   :  { %10 = vsyncpa [#allocation5 + $0x1], 0  ;;  %s1729_s12 = smov 0   ;;  %s1731_s13 = smov 0  }
   0x2   :  { %s1733_s14 = smov 0   ;;  %s1735_s15 = smov 0  }
   0x3   :  { %s1737_s16 = smov 0   ;;  %s1739_s17 = smov 0  }
   0x4   :  { %s1741_s18 = smov 0   ;;  %s1743_s19 = smov 0  }
   0x5   :  { %s1745_s20 = smov 0   ;;  %s1747_s21 = smov 0  }
   0x6 LB: > { %s1343_s22 = sadd.s32 4294967295, %s1695_s21   ;;  %s1344_s23 = sadd.s32 4294967294, %s1695_s21   ;;  %s1695_s21 = sphi %s1747_s21, %s16_s21   ;;  %s1691_s20 = sphi %s1745_s20, %s2802_s20   ;;  %s1687_s19 = sphi %s1743_s19, %s2801_s19   ;;  %s1683_s18 = sphi %s1741_s18, %s2800_s18   ;;  %s1679_s17 = sphi %s1739_s17, %s2799_s17   ;;  %s1675_s16 = sphi %s1737_s16, %s2798_s16   ;;  %s1671_s15 = sphi %s1735_s15, %s2797_s15   ;;  %s1667_s14 = sphi %s1733_s14, %s2796_s14   ;;  %s1663_s13 = sphi %s1731_s13, %s2795_s13   ;;  %s1659_s12 = sphi %s1729_s12, %s2794_s12  }
   0x7   : > { %s28_s24 = sadd.s32 1, %s1683_s18  ;;  %s31_s25 = sadd.s32 1, %s1687_s19 }
   0x8   : > { %p29_p0 = scmp.ge.s32.totalorder %s28_s24, 3  ;;  %s35_s26 = sadd.s32 1, %s1691_s20 }
   0x9   : > { %p126_p1 = scmp.ne.s32.totalorder %s1667_s14, %s1663_s13  ;;  %p127_p2 = scmp.eq.s32.totalorder %s1343_s22, 47 }
   0xa   : > { %s2804_s24 = smov (%p29_p0, %s28_s24), 0  ;;  %s2806_s25 = smov (!%p29_p0, %s31_s25), %s1687_s19 }
   0xb   : > { %p132_p3 = scmp.ne.s32.totalorder %s1663_s13, %s1659_s12  ;;  %p33_p4 = scmp.ge.s32.totalorder %s2806_s25, 8 }
   0xc   : > { %p133_p5 = scmp.eq.s32.totalorder %s1344_s23, 47  ;;  %p1791_p6 = por %p127_p2, %p126_p1 }
   0xd   : > { %s2808_s25 = smov (%p33_p4, %s2806_s25), 0  ;;  %s2810_s26 = smov (!%p33_p4, %s35_s26), %s1691_s20 }
   0xe   : > { %p1798_p7 = por %p133_p5, %p132_p3  ;;  %p1347_p8 = scmp.ge.s32.totalorder %s1695_s21, 1 }
   0xf   : > { %p37_p9 = scmp.ge.s32.totalorder %s2810_s26, 2  ;;  %p171_p10 = scmp.lt.s32.totalorder %s1695_s21, 49 }
  0x10   : > { %s112_s29 = ssub.s32 %s1687_s19, %s2808_s25  ;;  %s116_s5 = sadd.s32 1, %s1667_s14 }
  0x11   : > { %s2812_s26 = smov (%p37_p9, %s2810_s26), 0  ;;  %p172_p11 = pnand %p1347_p8, %p171_p10 }
  0x12   : > { %s111_s30 = ssub.s32 %s1691_s20, %s2812_s26 }
  0x13   : > { %s113_s4 = sor.u32 %s112_s29, %s111_s30  ;;  %175 = sbr.rel (%p172_p11) target bundleno = 588 (0x24c), region = 32 }
  0x14   : > { %p114_p12 = scmp.eq.s32.totalorder %s113_s4, 0 }
  0x16   : > { %s1812_s6 = scalar_select %p114_p12, %s1667_s14, %s116_s5  }
  0x18   : > { %s200_s7 = sadd.s32 %s1671_s15, %s1675_s16  ;;  %p201_p13 = scmp.lt.s32.totalorder %s1679_s17, 1  ;;  %vm619_vm0 = vcmask 1041408   ;;  %vm620_vm1 = vcmask 1045508   ;;  %vm395_vm2 = vcmask 1042432   ;;  %vm396_vm3 = vcmask 1046532  }
  0x19   : > { %p203_p0 = scmp.lt.s32.totalorder %s200_s7, 9  ;;  %vm1818_vm4 = vmor %vm619_vm0, %vm620_vm1  ;;  %vm236_vm6 = vsmask.f32 3328  ;;  %vm237_vm7 = vsmask.f32 7440  ;;  %s1697_s4 = smov 40  }
  0x1a   : > { %s202_s8 = scalar_select %p201_p13, %s1679_s17, 1  ;;  %vm1827_vm5 = vmor %vm395_vm2, %vm396_vm3  ;;  %vm515_vm8 = vsmask.f32 2304  ;;  %vm516_vm9 = vsmask.f32 6416  ;;  %vm841_vm15 = vcmask 1040384  }
  0x1b   : > { %s2814_s7 = smov (!%p203_p0, %s200_s7), 9  ;;  %s1698_s5 = smov 16   ;;  %vm1903_vm10 = vmor %vm236_vm6, %vm237_vm7  ;;  %vm739_vm12 = vsmask.f32 1280  ;;  %vm740_vm13 = vsmask.f32 5392 }
  0x1c   : > { %s1476_s9 = smul.u32 140, %s202_s8  ;;  %s1699_s8 = smov 24   ;;  %vm1933_vm11 = vmor %vm515_vm8, %vm516_vm9  ;;  %vm842_vm0 = vcmask 1044484   ;;  %vm225_vm2 = vcmask 60416   ;;  %vm1006_vm3 = vcmask 1043456   ;;  %vm1706_vm6 = vmmov 0  }
  0x1d   : > { %s1475_s10 = smul.u32 14, %s2814_s7  ;;  %s1700_s29 = smov 48   ;;  %vm1979_vm14 = vmor %vm739_vm12, %vm740_vm13  ;;  %vm459_vm7 = vcmask 191616   ;;  %vm504_vm8 = vcmask 257216   ;;  %vm683_vm9 = vcmask 388416   ;;  %vm905_vm12 = vcmask 585216  }
  0x1e   : > { %s1384_s7 = smul.u32 36, %s1671_s15  ;;  %vm2000_vm1 = vmor %vm841_vm15, %vm842_vm0  ;;  %vm990_vm13 = vcmask 588800   ;;  %p1368_p1 = scmp.ne.s32.totalorder %s1671_s15, 0 }
  0x1f   : > { %s207_s11 = sadd.s32 %s1476_s9, %s1475_s10  ;;  %s2740_s9 = sand.u32 1, %s1663_s13  }
  0x20   : > { %s1348_s22 = sshll.u32 %s207_s11, 2  ;;  %s1894_s10 = smul.u32 40, %s2740_s9 }
  0x21   : > { %s1825_s30 = scalar_lea.vmem %s2736_s0, %s1348_s22  ;;  %s1899_s23 = scalar_lea.vmem %s2737_s1, %s1384_s7 }
  0x22   : > { %v1832_v2 = vld [vmem:[%s1825_s30 + $0x4] sm:$0xf]  ;;  %v1835_v3 = vld [vmem:[%s1825_s30 + $0x8] sm:$0xf]  ;;  %v1838_v4 = vld [vmem:[%s1825_s30] sm:$0xf] }
  0x23   : > { %v1350_v5 = vrot.slane %v1832_v2, 10  ;;  %v624_v6 = vrot.slane %v1835_v3, 6  ;;  %v1349_v7 = vrot.slane %v1838_v4, 9  ;;  %v400_v8 = vrot.slane %v1832_v2, 5  ;;  %v1845_v9 = vld [vmem:[%s1825_s30 + $0xc] sm:$0xf] }
  0x24   : > { %v403_v10 = vrot.slane %v1835_v3, 5  ;;  %v627_v11 = vrot.slane %v1845_v9, 6  ;;  %v240_v12 = vshrl.u32 %v1838_v4, 16  ;;  %v243_v18 = vshll.u32 %v1838_v4, 16  ;;  %v1877_v32 = vld [vmem:[%s1825_s30 + $0x10] sm:$0xf] }
  0x25   : > { %v625_v13 = vsel %vm1818_vm4, %v1350_v5, %v624_v6  ;;  %v401_v14 = vsel %vm1827_vm5, %v1349_v7, %v400_v8  ;;  %v402_v15 = vrot.slane %v400_v8, 4  ;;  %v626_v16 = vrot.slane %v624_v6, 4  ;;  %v1929_v60 = vld [vmem:[%s1825_s30 + $0x1c] sm:$0xf]  ;;  %s1701_s7 = smov 8   ;;  %s1702_s11 = smov 32  }
  0x26   : > { %653 = vrot.lane.b32.xlu0 %v625_v13, %s1697_s4  ;;  %429 = vrot.lane.b32.xlu1 %v401_v14, %s1698_s5  ;;  %v242_v17 = vrot.slane %v240_v12, 4  ;;  %v249_v19 = vshll.u32 %v1832_v2, 16  ;;  %v405_v21 = vrot.slane %v403_v10, 4  ;;  %v406_v22 = vrot.slane %v1845_v9, 5  ;;  %s1703_s22 = smov 56   ;;  %s2755_s9 = smov 64  }
  0x27   : > { %v404_v20 = vsel %vm1827_vm5, %v402_v15, %v403_v10  ;;  %v628_v23 = vsel %vm1818_vm4, %v626_v16, %v627_v11  ;;  %v245_v24 = vrot.slane %v243_v18, 5  ;;  %v253_v26 = vshrl.u32 %v1832_v2, 16  ;;  %226 = vst.msk [vmem:[#allocation3] sm:$0xf] %vm225_vm2, %v1838_v4  ;;  %227 = vst.msk [vmem:[#allocation3 + $0x4] sm:$0xf] %vm225_vm2, %v1832_v2 }
  0x28   : > { %v251_v25 = vrot.slane %v249_v19, 5  ;;  %v629_v27 = vrot.slane %v627_v11, 4  ;;  %v1866_v28 = vshll.u32 %v1835_v3, 16  ;;  %v1869_v29 = vshrl.u32 %v1835_v3, 16  ;;  %v1952_v11 = vld [vmem:[%s1825_s30 + $0x18] sm:$0xf] }
  0x29   : > { %v1872_v30 = vshll.u32 %v1845_v9, 16  ;;  %v246_v31 = vor.u32 %v245_v24, %v242_v17  ;;  %v255_v33 = vrot.slane %v253_v26, 4  ;;  %v1880_v34 = vshrl.u32 %v1845_v9, 16  ;;  %228 = vst.msk [vmem:[#allocation3 + $0x8] sm:$0xf] %vm225_vm2, %v1835_v3 }
  0x2a   : > { %474 = vrot.lane.b32.xlu0 %v404_v20, %s1699_s8  ;;  %431 = vrot.lane.b32.xlu1 %v404_v20, %s1698_s5  ;;  %v518_v35 = vrot.slane %v253_v26, 5  ;;  %v1887_v36 = vsel %vm1827_vm5, %v405_v21, %v406_v22  ;;  %v522_v37 = vrot.slane %v1869_v29, 5  ;;  %v523_v38 = vrot.slane %v1866_v28, 6  ;;  %229 = vst.msk [vmem:[#allocation3 + $0xc] sm:$0xf] %vm225_vm2, %v1845_v9 }
  0x2b   : > { %v528_v39 = vrot.slane %v1872_v30, 6  ;;  %v247_v41 = vrot.slane %v246_v31, 4  ;;  %v256_v42 = vor.u32 %v255_v33, %v251_v25  ;;  %v527_v43 = vrot.slane %v1880_v34, 5  ;;  %230 = vst.msk [vmem:[#allocation3 + $0x10] sm:$0xf] %vm225_vm2, %v1877_v32 }
  0x2c   : > { %v519_v44 = vrot.slane %v249_v19, 6  ;;  %v630_v45 = vrot.slane %v1877_v32, 6  ;;  %v524_v46 = vor.u32 %v523_v38, %v522_v37  ;;  %v1910_v47 = vshll.u32 %v1877_v32, 16  ;;  %232 = vst.msk [vmem:[#allocation3 + $0x18] sm:$0xf] %vm225_vm2, %v1952_v11 }
  0x2d   : > { %v1913_v48 = vshrl.u32 %v1877_v32, 16  ;;  %v261_v49 = vrot.slane %v1866_v28, 5  ;;  %v746_v51 = vrot.slane %v1880_v34, 6  ;;  %v252_v52 = vsel %vm1903_vm10, %v247_v41, %v251_v25  ;;  %233 = vst.msk [vmem:[#allocation3 + $0x1c] sm:$0xf] %vm225_vm2, %v1929_v60 }
  0x2e   : > { %698 = vrot.lane.b32.xlu0 %v628_v23, %s1700_s29  ;;  %476 = vrot.lane.b32.xlu1 %v1887_v36, %s1699_s8  ;;  %v520_v50 = vor.u32 %v519_v44, %v518_v35  ;;  %v257_v53 = vrot.slane %v256_v42, 4  ;;  %v1922_v54 = vor.u32 %v528_v39, %v527_v43  ;;  %v747_v55 = vrot.slane %v1872_v30, 7 }
  0x2f   : > { %v526_v56 = vrot.slane %v524_v46, 4  ;;  %v751_v57 = vrot.slane %v1913_v48, 6  ;;  %v742_v58 = vrot.slane %v1869_v29, 6  ;;  %v743_v59 = vrot.slane %v1866_v28, 7 }
  0x30   : > { %v521_v62 = vrot.slane %v520_v50, 4  ;;  %v752_v63 = vrot.slane %v1910_v47, 7  ;;  %v748_v5 = vor.u32 %v747_v55, %v746_v51  ;;  %v1944_v6 = vsel %vm1818_vm4, %v629_v27, %v630_v45 }
  0x31   : > { %v262_v7 = vsel %vm1903_vm10, %v257_v53, %v261_v49  ;;  %v744_v8 = vor.u32 %v743_v59, %v742_v58  ;;  %v530_v10 = vsel %vm1933_vm11, %v526_v56, %v1922_v54  ;;  %v846_v14 = vrot.slane %v1845_v9, 7 }
  0x32   : > { %655 = vrot.lane.b32.xlu1 %v628_v23, %s1697_s4  ;;  %343 = vrot.lane.b32.xlu0 %v252_v52, %s1701_s7  ;;  %v525_v12 = vsel %vm1933_vm11, %v521_v62, %v524_v46  ;;  %v1956_v13 = vor.u32 %v752_v63, %v751_v57  ;;  %v1960_v15 = vshll.u32 %v1929_v60, 16  ;;  %v750_v16 = vrot.slane %v748_v5, 4  ;;  %v2020_v57 = vld [vmem:[%s1825_s30 + $0x14] sm:$0xf] }
  0x33   : > { %v271_v17 = vrot.slane %v1872_v30, 5  ;;  %v275_v18 = vrot.slane %v1880_v34, 4  ;;  %v1968_v19 = vshrl.u32 %v1929_v60, 16  ;;  %v745_v20 = vrot.slane %v744_v8, 4  ;;  %v1992_v34 = vld [vmem:[%s1825_s30 + $0x20] sm:$0xf] }
  0x34   : > { %v265_v21 = vrot.slane %v1869_v29, 4  ;;  %v1972_v23 = vshll.u32 %v1952_v11, 16  ;;  %v1975_v24 = vshrl.u32 %v1952_v11, 16  ;;  %v311_v26 = vrot.slane %v1960_v15, 5  ;;  %231 = vst.msk [vmem:[#allocation3 + $0x14] sm:$0xf] %vm225_vm2, %v2020_v57 }
  0x35   : > { %v315_v27 = vrot.slane %v1968_v19, 4  ;;  %v848_v30 = vrot.slane %v846_v14, 4  ;;  %v2743_v31 = vrot.slane %v1877_v32, 7  ;;  %v1351_v33 = vrot.slane %v1835_v3, 11  ;;  %234 = vst.msk [vmem:[#allocation3 + $0x20] sm:$0xf] %vm225_vm2, %v1992_v34 }
  0x36   : > { %700 = vrot.lane.b32.xlu1 %v1944_v6, %s1700_s29  ;;  %345 = vrot.lane.b32.xlu0 %v262_v7, %s1701_s7  ;;  %v2750_v28 = vrot.slane %v1972_v23, 5  ;;  %v305_v29 = vrot.slane %v1975_v24, 4  ;;  %v754_v35 = vsel %vm1979_vm14, %v750_v16, %v1956_v13  ;;  %v749_v37 = vsel %vm1979_vm14, %v745_v20, %v748_v5  ;;  %v2054_v20 = vld [vmem:[%s1825_s30 + $0x24] sm:$0xf] }
  0x37   : > { %v276_v39 = vor.u32 %v275_v18, %v271_v17  ;;  %v266_v41 = vor.u32 %v265_v21, %v261_v49  ;;  %v316_v42 = vor.u32 %v315_v27, %v311_v26  ;;  %v2005_v43 = vshll.u32 %v1992_v34, 16  ;;  %v2057_v21 = vld [vmem:[%s1825_s30 + $0x28] sm:$0xf]  ;;  %235 = vst.msk [vmem:[#allocation3 + $0x24] sm:$0xf] %vm225_vm2, %v2054_v20 }
  0x38   : > { %v306_v44 = vor.u32 %v305_v29, %v2750_v28  ;;  %v847_v46 = vsel %vm2000_vm1, %v1351_v33, %v846_v14  ;;  %v850_v49 = vsel %vm2000_vm1, %v848_v30, %v2743_v31  ;;  %v281_v51 = vrot.slane %v1910_v47, 5 }
  0x39   : > { %v277_v50 = vrot.slane %v276_v39, 4  ;;  %v267_v52 = vrot.slane %v266_v41, 4  ;;  %v317_v53 = vrot.slane %v316_v42, 4  ;;  %v2741_v55 = vrot.slane %v2005_v43, 5 }
  0x3a   : > { %580 = vrot.lane.b32.xlu1 %v530_v10, %s1702_s11  ;;  %578 = vrot.lane.b32.xlu0 %v525_v12, %s1702_s11  ;;  %v307_v56 = vrot.slane %v306_v44, 4  ;;  %v408_v58 = vrot.slane %v406_v22, 4  ;;  %v2027_v59 = vshrl.u32 %v2020_v57, 16  ;;  %v409_v5 = vrot.slane %v1877_v32, 5 }
  0x3b   : > { %v282_v62 = vsel %vm1903_vm10, %v277_v50, %v281_v51  ;;  %v272_v63 = vsel %vm1903_vm10, %v267_v52, %v271_v17  ;;  %v2037_v7 = vshrl.u32 %v1992_v34, 16  ;;  %v418_v8 = vrot.slane %v1929_v60, 5 }
  0x3c   : > { %v2041_v22 = vshll.u32 %v2020_v57, 16  ;;  %v532_v10 = vrot.slane %v1913_v48, 5  ;;  %v533_v12 = vrot.slane %v1910_v47, 6  ;;  %v322_v14 = vsel %vm1903_vm10, %v317_v53, %v2741_v55 }
  0x3d   : > { %v312_v16 = vsel %vm1903_vm10, %v307_v56, %v311_v26  ;;  %v421_v17 = vrot.slane %v1992_v34, 5  ;;  %v2742_v18 = vrot.slane %v1952_v11, 5  ;;  %v537_v27 = vrot.slane %v2027_v59, 5 }
  0x3e   : > { %802 = vrot.lane.b32.xlu1 %v754_v35, %s1703_s22  ;;  %800 = vrot.lane.b32.xlu0 %v749_v37, %s1703_s22  ;;  %v547_v29 = vrot.slane %v1968_v19, 5  ;;  %v548_v30 = vrot.slane %v1960_v15, 6  ;;  %v645_v26 = vrot.slane %v2054_v20, 6  ;;  %v2066_v33 = vshll.u32 %v2054_v20, 16 }
  0x3f   : > { %v2069_v35 = vshrl.u32 %v2054_v20, 16  ;;  %v552_v37 = vrot.slane %v2037_v7, 5  ;;  %v553_v39 = vrot.slane %v2005_v43, 6  ;;  %v534_v41 = vor.u32 %v533_v12, %v532_v10 }
  0x40   : > { %v538_v42 = vrot.slane %v2041_v22, 6  ;;  %v647_v44 = vrot.slane %v645_v26, 4  ;;  %v420_v50 = vrot.slane %v418_v8, 4  ;;  %v411_v52 = vrot.slane %v409_v5, 4 }
  0x41   : > { %v2744_v53 = vrot.slane %v2020_v57, 5  ;;  %v417_v56 = vrot.slane %v2742_v18, 4  ;;  %v558_v12 = vrot.slane %v2066_v33, 6  ;;  %v536_v55 = vrot.slane %v534_v41, 4 }
  0x42   : > { %877 = vrot.lane.b32.xlu1 %v850_v49, %s2755_s9  ;;  %875 = vrot.lane.b32.xlu0 %v847_v46, %s2755_s9  ;;  %v2748_v46 = vrot.slane %v2057_v21, 6  ;;  %v410_v49 = vsel %vm1827_vm5, %v408_v58, %v409_v5  ;;  %v554_v58 = vor.u32 %v553_v39, %v552_v37  ;;  %v557_v5 = vrot.slane %v2069_v35, 5 }
  0x43   : > { %v2094_v18 = vor.u32 %v538_v42, %v537_v27  ;;  %v422_v37 = vsel %vm1827_vm5, %v420_v50, %v421_v17  ;;  %v2109_v27 = vsel %vm1827_vm5, %v411_v52, %v2744_v53  ;;  %v2115_v39 = vsel %vm1827_vm5, %v417_v56, %v418_v8 }
  0x44   : > { %v2088_v10 = vsel %vm1818_vm4, %v647_v44, %v2748_v46  ;;  %v633_v44 = vrot.slane %v2020_v57, 6  ;;  %2770 = vst [vmem:[#allocation7_spill] sm:$0xff] %v2109_v27  ;;  %2771 = vst [vmem:[#allocation8_spill] sm:$0xff] %v2115_v39  ;;  %v556_v42 = vrot.slane %v554_v58, 4  ;;  %v2117_v31 = vor.u32 %v558_v12, %v557_v5 }
  0x45   : > { %v2128_v50 = vsel %vm1933_vm11, %v536_v55, %v2094_v18  ;;  %v2746_v8 = vrot.slane %v2054_v20, 7  ;;  %v2749_v12 = vrot.slane %v2057_v21, 7  ;;  %v772_v2 = vrot.slane %v2005_v43, 7 }
  0x46   : > { %349 = vrot.lane.b32.xlu1 %v282_v62, %s1701_s7  ;;  %347 = vrot.lane.b32.xlu0 %v272_v63, %s1701_s7  ;;  %v423_v62 = vrot.slane %v421_v17, 4  ;;  %v2082_v63 = vor.u32 %v548_v30, %v547_v29  ;;  %v531_v29 = vrot.slane %v1922_v54, 4  ;;  %v632_v30 = vrot.slane %v630_v45, 4 }
  0x47   : > { %v2745_v45 = vrot.slane %v1929_v60, 6  ;;  %v2139_v5 = vrot.slane %v633_v44, 4  ;;  %v767_v61 = vrot.slane %v1960_v15, 7  ;;  %v325_v25 = vrot.slane %v2037_v7, 4 }
  0x48   : > { %v551_v54 = vrot.slane %v2082_v63, 4  ;;  %v2132_v52 = vsel %vm1933_vm11, %v531_v29, %v534_v41  ;;  %v2137_v56 = vsel %vm1818_vm4, %v632_v30, %v633_v44  ;;  %v866_v29 = vrot.slane %v2746_v8, 4 }
  0x49   : > { %v2152_v41 = vrot.slane %v2745_v45, 4  ;;  %v291_v30 = vrot.slane %v2041_v22, 5  ;;  %v2160_v44 = vsel %vm1933_vm11, %v556_v42, %v2117_v31  ;;  %v2169_v45 = vshll.u32 %v2057_v21, 16 }
  0x4a   : > { %357 = vrot.lane.b32.xlu1 %v322_v14, %s1701_s7  ;;  %355 = vrot.lane.b32.xlu0 %v312_v16, %s1701_s7  ;;  %v2747_v14 = vrot.slane %v1992_v34, 6  ;;  %v424_v16 = vrot.slane %v2054_v20, 5  ;;  %v2148_v55 = vsel %vm1933_vm11, %v551_v54, %v554_v58  ;;  %v295_v58 = vrot.slane %v2027_v59, 4 }
  0x4b   : > { %v285_v54 = vrot.slane %v1913_v48, 4  ;;  %v2175_v8 = vsel %vm2000_vm1, %v866_v29, %v2749_v12  ;;  %v2753_v42 = vrot.slane %v2066_v33, 5  ;;  %v341_v12 = vrot.slane %v2169_v45, 5 }
  0x4c   : > { %v2123_v17 = vsel %vm1827_vm5, %v423_v62, %v424_v16  ;;  %v2180_v62 = vld [vmem:[%s1825_s30 + $0x2c] sm:$0xf]  ;;  %v296_v48 = vor.u32 %v295_v58, %v291_v30  ;;  %v426_v28 = vrot.slane %v424_v16, 4  ;;  %v2773_v16 = vrot.slane %v1972_v23, 5 }
  0x4d   : > { %2772 = vst [vmem:[#allocation9_spill] sm:$0xff] %v2123_v17  ;;  %v286_v46 = vor.u32 %v285_v54, %v281_v51  ;;  %v472_v47 = vrot.slane %v2180_v62, 5  ;;  %v762_v51 = vrot.slane %v1972_v23, 7 }
  0x4e   : > { %435 = vrot.lane.b32.xlu1 %v410_v49, %s1698_s5  ;;  %433 = vrot.lane.b32.xlu0 %v1887_v36, %s1698_s5  ;;  %v644_v36 = vrot.slane %v2747_v14, 4  ;;  %v335_v14 = vrot.slane %v2069_v35, 4 }
  0x4f   : > { %v287_v58 = vrot.slane %v286_v46, 4 }
  0x50   : > { %v2164_v53 = vsel %vm1818_vm4, %v644_v36, %v645_v26  ;;  %v336_v29 = vor.u32 %v335_v14, %v2753_v42  ;;  %v297_v36 = vrot.slane %v296_v48, 4  ;;  %v562_v14 = vshrl.u32 %v2057_v21, 16 }
  0x51   : > { %v2209_v46 = vsel %vm1903_vm10, %v287_v58, %v291_v30  ;;  %v542_v48 = vrot.slane %v1975_v24, 5  ;;  %v541_v30 = vrot.slane %v2094_v18, 4  ;;  %v570_v26 = vshrl.u32 %v2180_v62, 16 }
  0x52   : > { %443 = vrot.lane.b32.xlu1 %v422_v37, %s1698_s5  ;;  %441 = vrot.lane.b32.xlu0 %v2115_v39, %s1698_s5  ;;  %v427_v39 = vrot.slane %v2057_v21, 5  ;;  %v337_v54 = vrot.slane %v336_v29, 4  ;;  %v2205_v42 = vsel %vm1903_vm10, %v297_v36, %v2773_v16  ;;  %v543_v36 = vrot.slane %v1972_v23, 6 }
  0x53   : > { %v771_v29 = vrot.slane %v2037_v7, 6  ;;  %v564_v58 = vrot.slane %v562_v14, 5  ;;  %v565_v16 = vrot.slane %v2169_v45, 6  ;;  %v572_v23 = vrot.slane %v570_v26, 5 }
  0x54   : > { %v2784_v7 = vrot.slane %v2066_v33, 5  ;;  %v2788_v40 = vld [vmem:[#allocation9_spill] sm:$0xff] }
  0x56   : > { %480 = vrot.lane.b32.xlu1 %v2109_v27, %s1699_s8  ;;  %478 = vrot.lane.b32.xlu0 %v410_v49, %s1699_s8  ;;  %v2198_v49 = vsel %vm1827_vm5, %v426_v28, %v427_v39  ;;  %v471_v27 = vrot.slane %v427_v39, 4  ;;  %v2217_v28 = vsel %vm1903_vm10, %v337_v54, %v341_v12  ;;  %v561_v12 = vrot.slane %v2117_v31, 4  ;;  %v1577_v31 = vld [vmem:[%s1899_s23 + $0x20] ss:$0 sps:$4 sm:$0xff]  }
  0x57   : > { %v781_v54 = vrot.slane %v562_v14, 6  ;;  %v2774_v14 = vrot.slane %v2057_v21, 6 }
  0x58   : > { %v2221_v39 = vsel %vm1827_vm5, %v471_v27, %v472_v47  ;;  %v782_v27 = vrot.slane %v2169_v45, 7  ;;  %v566_v47 = vor.u32 %v565_v16, %v564_v58  ;;  %v2271_v16 = vld [vmem:[%s1825_s30 + $0x30] sm:$0xf]  ;;  %s2621_s30 = scalar_lea.vmem [#allocation4], %s1894_s10 }
  0x5a   : > { %488 = vrot.lane.b32.xlu1 %v2123_v17, %s1699_s8  ;;  %486 = vrot.lane.b32.xlu0 %v422_v37, %s1699_s8  ;;  %v544_v37 = vor.u32 %v543_v36, %v542_v48  ;;  %v573_v17 = vshll.u32 %v2180_v62, 16  ;;  %v568_v18 = vrot.slane %v566_v47, 4  ;;  %v2253_v45 = vsel %vm1933_vm11, %v561_v12, %v566_v47 }
  0x5b   : > { %v651_v48 = vrot.slane %v2180_v62, 6  ;;  %v2777_v47 = vrot.slane %v2027_v59, 6  ;;  %v2779_v59 = vrot.slane %v1975_v24, 6  ;;  %v766_v24 = vrot.slane %v1968_v19, 6 }
  0x5c   : > { %v546_v3 = vrot.slane %v544_v37, 4  ;;  %v2248_v4 = vsel %vm1933_vm11, %v541_v30, %v544_v37  ;;  %v575_v9 = vrot.slane %v573_v17, 6  ;;  %v2776_v37 = vrot.slane %v1992_v34, 6 }
  0x5d   : > { %v768_v15 = vor.u32 %v767_v61, %v766_v24 }
  0x5e   : > { %584 = vrot.lane.b32.xlu1 %v2128_v50, %s1702_s11  ;;  %582 = vrot.lane.b32.xlu0 %v2132_v52, %s1702_s11  ;;  %v650_v50 = vrot.slane %v2774_v14, 4  ;;  %v2775_v52 = vrot.slane %v1952_v11, 6  ;;  %v2268_v30 = vsel %vm1933_vm11, %v546_v3, %v2082_v63  ;;  %v576_v58 = vor.u32 %v575_v9, %v572_v23 }
  0x5f   : > { %v2278_v12 = vsel %vm1818_vm4, %v2152_v41, %v2776_v37  ;;  %v1705_v23 = vmov 0.0   ;;  %v2300_v41 = vor.u32 %v782_v27, %v781_v54  ;;  %v1008_v9 = vsel %vm1006_vm3, %v1577_v31, 0 }
  0x60   : > { %v2263_v36 = vsel %vm1818_vm4, %v2139_v5, %v2775_v52  ;;  %v2778_v5 = vrot.slane %v2041_v22, 7  ;;  %v2288_v63 = vsel %vm1818_vm4, %v650_v50, %v651_v48  ;;  %1434 = vmatprep.subr.bf16.mxu0 %v1705_v23  ;;  %1464 = vmatprep.subr.bf16.mxu1 %v1705_v23  ;;  %v2298_v22 = vor.u32 %v762_v51, %v2779_v59 }
  0x61   : > { %v2304_v3 = vsel %vm1933_vm11, %v568_v18, %v576_v58  ;;  %v2306_v50 = vor.u32 %v772_v2, %v771_v29  ;;  %v855_v52 = vrot.slane %v1952_v11, 7  ;;  %1435 = vmatpush3.bf16.msra.mxu0 %v1008_v9  ;;  %v695_v37 = vrot.slane %v651_v48, 4  ;;  %1469 = vmatpush3.bf16.msra.mxu1 %v1008_v9  ;;  %v1579_v18 = vld [vmem:[%s1899_s23 + $0x10] sm:$0xff]  }
  0x62   : > { %v2284_v14 = vor.u32 %v2778_v5, %v2777_v47  ;;  %592 = vrot.lane.b32.xlu1 %v2160_v44, %s1702_s11  ;;  %590 = vrot.lane.b32.xlu0 %v2148_v55, %s1702_s11  ;;  %v1578_v44 = vld [vmem:[%s1899_s23 + $0x18] sm:$0xff]   ;;  %v696_v55 = vrot.slane %v2271_v16, 6  ;;  %v765_v51 = vrot.slane %v2298_v22, 4  ;;  %v786_v54 = vrot.slane %v570_v26, 6 }
  0x63   : > { %1436 = vmatprep.subr.bf16.mxu0 %v1705_v23  ;;  %1465 = vmatprep.subr.bf16.mxu1 %v1705_v23  ;;  %v787_v27 = vrot.slane %v573_v17, 7  ;;  %v792_v2 = vshrl.u32 %v2271_v16, 16  ;;  %v795_v31 = vshll.u32 %v2271_v16, 16  ;;  %v785_v19 = vrot.slane %v2300_v41, 4 }
  0x64   : > { %v2318_v29 = vsel %vm1818_vm4, %v695_v37, %v696_v55  ;;  %v858_v26 = vrot.slane %v1929_v60, 7  ;;  %1444 = vmatprep.mubr.msk.bf16.mxu0 %vm1706_vm6, %v1705_v23  ;;  %v857_v47 = vrot.slane %v855_v52, 4  ;;  %v861_v5 = vrot.slane %v1992_v34, 7  ;;  %1456 = vmatprep.mubr.msk.bf16.mxu1 %vm1706_vm6, %v1705_v23 }
  0x65   : > { %1437 = vmatpush3.bf16.msra.mxu0 %v1578_v44  ;;  %v788_v48 = vor.u32 %v787_v27, %v786_v54  ;;  %v794_v58 = vrot.slane %v792_v2, 6  ;;  %v797_v17 = vrot.slane %v795_v31, 7  ;;  %v2337_v59 = vsel %vm1979_vm14, %v765_v51, %v768_v15  ;;  %1470 = vmatpush3.bf16.msra.mxu1 %v1578_v44  ;;  %v1580_v31 = vld [vmem:[%s1899_s23 + $0x8] sm:$0xff]  }
  0x66   : > { %659 = vrot.lane.b32.xlu1 %v2137_v56, %s1697_s4  ;;  %657 = vrot.lane.b32.xlu0 %v1944_v6, %s1697_s4  ;;  %v770_v6 = vrot.slane %v768_v15, 4  ;;  %v860_v9 = vrot.slane %v858_v26, 4  ;;  %v2345_v61 = vsel %vm2000_vm1, %v857_v47, %v858_v26  ;;  %v870_v51 = vrot.slane %v2180_v62, 7 }
  0x67   : > { %1438 = vmatprep.subr.bf16.mxu0 %v1705_v23  ;;  %v790_v37 = vrot.slane %v788_v48, 4  ;;  %v798_v55 = vor.u32 %v797_v17, %v794_v58  ;;  %v2341_v24 = vsel %vm1979_vm14, %v785_v19, %v788_v48  ;;  %1466 = vmatprep.subr.bf16.mxu1 %v1705_v23  ;;  %v873_v54 = vrot.slane %v2271_v16, 7  ;;  %v1581_v58 = vld [vmem:[%s1899_s23] sm:$0xff]  }
  0x68   : > { %v2357_v34 = vsel %vm1979_vm14, %v770_v6, %v2306_v50  ;;  %v2361_v44 = vsel %vm2000_vm1, %v860_v9, %v861_v5  ;;  %v776_v27 = vrot.slane %v2069_v35, 6  ;;  %v777_v2 = vrot.slane %v2066_v33, 7  ;;  %v2787_v33 = vld [vmem:[#allocation7_spill] sm:$0xff] }
  0x69   : > { %1439 = vmatpush3.bf16.msra.mxu0 %v1579_v18  ;;  %v2370_v15 = vsel %vm1979_vm14, %v790_v37, %v798_v55  ;;  %v2780_v19 = vrot.slane %v2057_v21, 7  ;;  %v872_v48 = vrot.slane %v870_v51, 4  ;;  %1471 = vmatpush3.bf16.msra.mxu1 %v1579_v18  ;;  %v755_v35 = vrot.slane %v1956_v13, 4 }
  0x6a   : > { %667 = vrot.lane.b32.xlu1 %v2164_v53, %s1697_s4  ;;  %665 = vrot.lane.b32.xlu0 %v2278_v12, %s1697_s4  ;;  %v760_v16 = vrot.slane %v2284_v14, 4  ;;  %v778_v18 = vor.u32 %v777_v2, %v776_v27  ;;  %v775_v47 = vrot.slane %v2306_v50, 4  ;;  %v852_v6 = vrot.slane %v2020_v57, 7 }
  0x6b   : > { %v869_v26 = vrot.slane %v2780_v19, 4  ;;  %1440 = vmatprep.subr.bf16.mxu0 %v1705_v23  ;;  %1467 = vmatprep.subr.bf16.mxu1 %v1705_v23  ;;  %v2387_v21 = vsel %vm2000_vm1, %v872_v48, %v873_v54  ;;  %v759_v13 = vsel %vm1979_vm14, %v755_v35, %v2284_v14  ;;  %v2783_v54 = vrot.slane %v2005_v43, 5 }
  0x6c   : > { %v780_v17 = vrot.slane %v778_v18, 4  ;;  %v779_v14 = vsel %vm1979_vm14, %v775_v47, %v778_v18  ;;  %v854_v9 = vrot.slane %v852_v6, 4  ;;  %v2785_v43 = vrot.slane %v2020_v57, 5  ;;  %v2789_v57 = vld [vmem:[#allocation8_spill] sm:$0xff] }
  0x6d   : > { %v2377_v62 = vsel %vm2000_vm1, %v869_v26, %v870_v51  ;;  %1441 = vmatpush3.bf16.msra.mxu0 %v1580_v31  ;;  %1472 = vmatpush3.bf16.msra.mxu1 %v1580_v31  ;;  %v326_v27 = vor.u32 %v325_v25, %v2783_v54  ;;  %v2790_v2 = vrot.slane %v1952_v11, 6  ;;  %vm830_vm11 = vcmask 519616  }
  0x6e   : > { %704 = vrot.lane.b32.xlu1 %v2263_v36, %s1700_s29  ;;  %702 = vrot.lane.b32.xlu0 %v2137_v56, %s1700_s29  ;;  %v764_v56 = vsel %vm1979_vm14, %v760_v16, %v2298_v22  ;;  %v2781_v22 = vrot.slane %v1877_v32, 7  ;;  %v856_v50 = vsel %vm2000_vm1, %v854_v9, %v855_v52  ;;  %v2782_v32 = vrot.slane %v2054_v20, 7 }
  0x6f   : > { %1442 = vmatprep.subr.bf16.mxu0 %v1705_v23  ;;  %1468 = vmatprep.subr.bf16.mxu1 %v1705_v23  ;;  %v327_v52 = vrot.slane %v326_v27, 4  ;;  %v414_v20 = vrot.slane %v2785_v43, 4  ;;  %v638_v31 = vrot.slane %v2790_v2, 4 }
  0x70   : > { %v851_v37 = vrot.slane %v2781_v22, 4 }
  0x71   : > { %1443 = vmatpush3.bf16.msra.mxu0 %v1581_v58  ;;  %1473 = vmatpush3.bf16.msra.mxu1 %v1581_v58  ;;  %v332_v38 = vsel %vm1903_vm10, %v327_v52, %v2784_v7  ;;  %vm728_vm10 = vcmask 454016  }
  0x72   : > { %712 = vrot.lane.b32.xlu1 %v2088_v10, %s1700_s29  ;;  %710 = vrot.lane.b32.xlu0 %v2164_v53, %s1700_s29  ;;  %v784_v53 = vsel %vm1979_vm14, %v780_v17, %v2300_v41  ;;  %v853_v55 = vsel %vm2000_vm1, %v851_v37, %v852_v6  ;;  %v863_v41 = vrot.slane %v861_v5, 4 }
  0x74   : > { %v865_v51 = vsel %vm2000_vm1, %v863_v41, %v2782_v32 }
  0x76   : > { %806 = vrot.lane.b32.xlu1 %v764_v56, %s1703_s22  ;;  %804 = vrot.lane.b32.xlu0 %v759_v13, %s1703_s22 }
  0x7a   : > { %814 = vrot.lane.b32.xlu1 %v784_v53, %s1703_s22  ;;  %812 = vrot.lane.b32.xlu0 %v779_v14, %s1703_s22 }
  0x7e   : > { %881 = vrot.lane.b32.xlu1 %v856_v50, %s2755_s9  ;;  %879 = vrot.lane.b32.xlu0 %v853_v55, %s2755_s9 }
  0x82   : > { %889 = vrot.lane.b32.xlu1 %v2175_v8, %s2755_s9  ;;  %887 = vrot.lane.b32.xlu0 %v865_v51, %s2755_s9  ;;  %v2786_v8 = vrot.slane %v1952_v11, 5 }
  0x86   : > { %353 = vrot.lane.b32.xlu1 %v2205_v42, %s1701_s7  ;;  %351 = vrot.lane.b32.xlu0 %v2209_v46, %s1701_s7  ;;  %v416_v42 = vsel %vm1827_vm5, %v414_v20, %v2786_v8  ;;  %vm373_vm5 = vcmask 126016  }
  0x8a   : > { %361 = vrot.lane.b32.xlu1 %v2217_v28, %s1701_s7  ;;  %359 = vrot.lane.b32.xlu0 %v332_v38, %s1701_s7 }
  0x8e   : > { %439 = vrot.lane.b32.xlu1 %v416_v42, %s1698_s5  ;;  %437 = vrot.lane.b32.xlu0 %v2787_v33, %s1698_s5 }
  0x92   : > { %447 = vrot.lane.b32.xlu1 %v2198_v49, %s1698_s5  ;;  %445 = vrot.lane.b32.xlu0 %v2788_v40, %s1698_s5 }
  0x96   : > { %484 = vrot.lane.b32.xlu1 %v2789_v57, %s1699_s8  ;;  %482 = vrot.lane.b32.xlu0 %v416_v42, %s1699_s8 }
  0x98   : > { %v654_v46 = vpop.permute.xlu0 %653  ;;  %v430_v28 = vpop.permute.xlu1 %429 }
  0x9a   : > { %492 = vrot.lane.b32.xlu1 %v2221_v39, %s1699_s8  ;;  %490 = vrot.lane.b32.xlu0 %v2198_v49, %s1699_s8  ;;  %v2791_v49 = vrot.slane %v1929_v60, 6 }
  0x9c   : > { %v475_v1 = vpop.permute.xlu0 %474  ;;  %v432_v5 = vpop.permute.xlu1 %431  ;;  %v640_v39 = vsel %vm1818_vm4, %v638_v31, %v2791_v49  ;;  %vm608_vm4 = vcmask 322816  }
  0x9e   : > { %588 = vrot.lane.b32.xlu1 %v2268_v30, %s1702_s11  ;;  %586 = vrot.lane.b32.xlu0 %v2248_v4, %s1702_s11 }
  0xa0   : > { %v699_v19 = vpop.permute.xlu0 %698  ;;  %v477_v26 = vpop.permute.xlu1 %476 }
  0xa2   : > { %596 = vrot.lane.b32.xlu1 %v2304_v3, %s1702_s11  ;;  %594 = vrot.lane.b32.xlu0 %v2253_v45, %s1702_s11 }
  0xa4   : > { %v656_v30 = vpop.permute.xlu1 %655  ;;  %v344_v4 = vpop.permute.xlu0 %343 }
  0xa5   : > { %374 = vst.msk [vmem:[#allocation3] sm:$0xf] %vm373_vm5, %v344_v4 }
  0xa6   : > { %460 = vst.msk [vmem:[#allocation3] sm:$0xf] %vm459_vm7, %v430_v28  ;;  %663 = vrot.lane.b32.xlu1 %v640_v39, %s1697_s4  ;;  %661 = vrot.lane.b32.xlu0 %v2263_v36, %s1697_s4 }
  0xa7   : > { %505 = vst.msk [vmem:[#allocation3] sm:$0xf] %vm504_vm8, %v475_v1 }
  0xa8   : > { %v701_v11 = vpop.permute.xlu1 %700  ;;  %v346_v45 = vpop.permute.xlu0 %345 }
  0xa9   : > { %375 = vst.msk [vmem:[#allocation3 + $0x4] sm:$0xf] %vm373_vm5, %v346_v45 }
  0xaa   : > { %461 = vst.msk [vmem:[#allocation3 + $0x4] sm:$0xf] %vm459_vm7, %v432_v5  ;;  %671 = vrot.lane.b32.xlu1 %v2288_v63, %s1697_s4  ;;  %669 = vrot.lane.b32.xlu0 %v2088_v10, %s1697_s4 }
  0xab   : > { %506 = vst.msk [vmem:[#allocation3 + $0x4] sm:$0xf] %vm504_vm8, %v477_v26 }
  0xac   : > { %v581_v0 = vpop.permute.xlu1 %580  ;;  %v579_v60 = vpop.permute.xlu0 %578 }
  0xad   : > { %610 = vst.msk [vmem:[#allocation3 + $0x4] sm:$0xf] %vm608_vm4, %v581_v0  ;;  %609 = vst.msk [vmem:[#allocation3] sm:$0xf] %vm608_vm4, %v579_v60 }
  0xae   : > { %685 = vst.msk [vmem:[#allocation3 + $0x4] sm:$0xf] %vm683_vm9, %v656_v30  ;;  %684 = vst.msk [vmem:[#allocation3] sm:$0xf] %vm683_vm9, %v654_v46  ;;  %708 = vrot.lane.b32.xlu1 %v2278_v12, %s1700_s29  ;;  %706 = vrot.lane.b32.xlu0 %v640_v39, %s1700_s29 }
  0xaf   : > { %730 = vst.msk [vmem:[#allocation3 + $0x4] sm:$0xf] %vm728_vm10, %v701_v11  ;;  %729 = vst.msk [vmem:[#allocation3] sm:$0xf] %vm728_vm10, %v699_v19 }
  0xb0   : > { %v803_v10 = vpop.permute.xlu1 %802  ;;  %v801_v36 = vpop.permute.xlu0 %800 }
  0xb1   : > { %832 = vst.msk [vmem:[#allocation3 + $0x4] sm:$0xf] %vm830_vm11, %v803_v10  ;;  %831 = vst.msk [vmem:[#allocation3] sm:$0xf] %vm830_vm11, %v801_v36 }
  0xb2   : > { %716 = vrot.lane.b32.xlu1 %v2318_v29, %s1700_s29  ;;  %714 = vrot.lane.b32.xlu0 %v2288_v63, %s1700_s29 }
  0xb4   : > { %v878_v12 = vpop.permute.xlu1 %877  ;;  %v876_v3 = vpop.permute.xlu0 %875 }
  0xb5   : > { %907 = vst.msk [vmem:[#allocation3 + $0x4] sm:$0xf] %vm905_vm12, %v878_v12  ;;  %906 = vst.msk [vmem:[#allocation3] sm:$0xf] %vm905_vm12, %v876_v3 }
  0xb6   : > { %810 = vrot.lane.b32.xlu1 %v2357_v34, %s1703_s22  ;;  %808 = vrot.lane.b32.xlu0 %v2337_v59, %s1703_s22 }
  0xb8   : > { %v350_v48 = vpop.permute.xlu1 %349  ;;  %v348_v35 = vpop.permute.xlu0 %347 }
  0xb9   : > { %377 = vst.msk [vmem:[#allocation3 + $0xc] sm:$0xf] %vm373_vm5, %v350_v48  ;;  %376 = vst.msk [vmem:[#allocation3 + $0x8] sm:$0xf] %vm373_vm5, %v348_v35 }
  0xba   : > { %818 = vrot.lane.b32.xlu1 %v2370_v15, %s1703_s22  ;;  %816 = vrot.lane.b32.xlu0 %v2341_v24, %s1703_s22 }
  0xbc   : > { %v358_v63 = vpop.permute.xlu1 %357  ;;  %v356_v29 = vpop.permute.xlu0 %355  ;;  %v1582_v16 = vld [vmem:[#allocation3] sm:$0xff]  }
  0xbd   : > { %381 = vst.msk [vmem:[#allocation3 + $0x1c] sm:$0xf] %vm373_vm5, %v358_v63  ;;  %380 = vst.msk [vmem:[#allocation3 + $0x18] sm:$0xf] %vm373_vm5, %v356_v29  ;;  %1445 = vmatmul.mubr.msk.bf16.vlgmr.msra.gmra.mxu0 %vm990_vm13, %v1582_v16 }
  0xbe   : > { %885 = vrot.lane.b32.xlu1 %v2361_v44, %s2755_s9  ;;  %883 = vrot.lane.b32.xlu0 %v2345_v61, %s2755_s9 }
  0xbf   : > { %1448 = vmatprep.mubr.msk.bf16.mxu0 %vm1706_vm6, %v1705_v23 }
  0xc0   : > { %v436_v59 = vpop.permute.xlu1 %435  ;;  %v434_v34 = vpop.permute.xlu0 %433 }
  0xc1   : > { %463 = vst.msk [vmem:[#allocation3 + $0xc] sm:$0xf] %vm459_vm7, %v436_v59  ;;  %462 = vst.msk [vmem:[#allocation3 + $0x8] sm:$0xf] %vm459_vm7, %v434_v34 }
  0xc2   : > { %893 = vrot.lane.b32.xlu1 %v2387_v21, %s2755_s9  ;;  %891 = vrot.lane.b32.xlu0 %v2377_v62, %s2755_s9 }
  0xc4   : > { %v444_v24 = vpop.permute.xlu1 %443  ;;  %v442_v44 = vpop.permute.xlu0 %441 }
  0xc5   : > { %467 = vst.msk [vmem:[#allocation3 + $0x1c] sm:$0xf] %vm459_vm7, %v444_v24  ;;  %466 = vst.msk [vmem:[#allocation3 + $0x18] sm:$0xf] %vm459_vm7, %v442_v44 }
  0xc8   : > { %v481_v61 = vpop.permute.xlu1 %480  ;;  %v479_v15 = vpop.permute.xlu0 %478 }
  0xc9   : > { %508 = vst.msk [vmem:[#allocation3 + $0xc] sm:$0xf] %vm504_vm8, %v481_v61  ;;  %507 = vst.msk [vmem:[#allocation3 + $0x8] sm:$0xf] %vm504_vm8, %v479_v15 }
  0xcc   : > { %v489_v18 = vpop.permute.xlu1 %488  ;;  %v487_v58 = vpop.permute.xlu0 %486 }
  0xcd   : > { %512 = vst.msk [vmem:[#allocation3 + $0x1c] sm:$0xf] %vm504_vm8, %v489_v18  ;;  %511 = vst.msk [vmem:[#allocation3 + $0x18] sm:$0xf] %vm504_vm8, %v487_v58 }
  0xd0   : > { %v585_v21 = vpop.permute.xlu1 %584  ;;  %v583_v62 = vpop.permute.xlu0 %582 }
  0xd1   : > { %612 = vst.msk [vmem:[#allocation3 + $0xc] sm:$0xf] %vm608_vm4, %v585_v21  ;;  %611 = vst.msk [vmem:[#allocation3 + $0x8] sm:$0xf] %vm608_vm4, %v583_v62 }
  0xd4   : > { %v593_v13 = vpop.permute.xlu1 %592  ;;  %v591_v56 = vpop.permute.xlu0 %590 }
  0xd5   : > { %616 = vst.msk [vmem:[#allocation3 + $0x1c] sm:$0xf] %vm608_vm4, %v593_v13  ;;  %615 = vst.msk [vmem:[#allocation3 + $0x18] sm:$0xf] %vm608_vm4, %v591_v56 }
  0xd8   : > { %v660_v17 = vpop.permute.xlu1 %659  ;;  %v658_v47 = vpop.permute.xlu0 %657 }
  0xd9   : > { %687 = vst.msk [vmem:[#allocation3 + $0xc] sm:$0xf] %vm683_vm9, %v660_v17  ;;  %686 = vst.msk [vmem:[#allocation3 + $0x8] sm:$0xf] %vm683_vm9, %v658_v47 }
  0xdc   : > { %v668_v6 = vpop.permute.xlu1 %667  ;;  %v666_v53 = vpop.permute.xlu0 %665 }
  0xdd   : > { %691 = vst.msk [vmem:[#allocation3 + $0x1c] sm:$0xf] %vm683_vm9, %v668_v6  ;;  %690 = vst.msk [vmem:[#allocation3 + $0x18] sm:$0xf] %vm683_vm9, %v666_v53 }
  0xe0   : > { %v705_v14 = vpop.permute.xlu1 %704  ;;  %v703_v9 = vpop.permute.xlu0 %702 }
  0xe1   : > { %732 = vst.msk [vmem:[#allocation3 + $0xc] sm:$0xf] %vm728_vm10, %v705_v14  ;;  %731 = vst.msk [vmem:[#allocation3 + $0x8] sm:$0xf] %vm728_vm10, %v703_v9 }
  0xe4   : > { %v713_v22 = vpop.permute.xlu1 %712  ;;  %v711_v37 = vpop.permute.xlu0 %710 }
  0xe5   : > { %736 = vst.msk [vmem:[#allocation3 + $0x1c] sm:$0xf] %vm728_vm10, %v713_v22  ;;  %735 = vst.msk [vmem:[#allocation3 + $0x18] sm:$0xf] %vm728_vm10, %v711_v37 }
  0xe8   : > { %v807_v50 = vpop.permute.xlu1 %806  ;;  %v805_v55 = vpop.permute.xlu0 %804 }
  0xe9   : > { %834 = vst.msk [vmem:[#allocation3 + $0xc] sm:$0xf] %vm830_vm11, %v807_v50  ;;  %833 = vst.msk [vmem:[#allocation3 + $0x8] sm:$0xf] %vm830_vm11, %v805_v55 }
  0xec   : > { %v815_v41 = vpop.permute.xlu1 %814  ;;  %v813_v25 = vpop.permute.xlu0 %812 }
  0xed   : > { %838 = vst.msk [vmem:[#allocation3 + $0x1c] sm:$0xf] %vm830_vm11, %v815_v41  ;;  %837 = vst.msk [vmem:[#allocation3 + $0x18] sm:$0xf] %vm830_vm11, %v813_v25 }
  0xf0   : > { %v882_v32 = vpop.permute.xlu1 %881  ;;  %v880_v51 = vpop.permute.xlu0 %879 }
  0xf1   : > { %909 = vst.msk [vmem:[#allocation3 + $0xc] sm:$0xf] %vm905_vm12, %v882_v32  ;;  %908 = vst.msk [vmem:[#allocation3 + $0x8] sm:$0xf] %vm905_vm12, %v880_v51 }
  0xf4   : > { %v890_v54 = vpop.permute.xlu1 %889  ;;  %v888_v27 = vpop.permute.xlu0 %887 }
  0xf5   : > { %913 = vst.msk [vmem:[#allocation3 + $0x1c] sm:$0xf] %vm905_vm12, %v890_v54  ;;  %912 = vst.msk [vmem:[#allocation3 + $0x18] sm:$0xf] %vm905_vm12, %v888_v27 }
  0xf8   : > { %v354_v52 = vpop.permute.xlu1 %353  ;;  %v352_v7 = vpop.permute.xlu0 %351  ;;  %v1583_v38 = vld [vmem:[#allocation3 + $0x8] sm:$0xff]  }
  0xf9   : > { %379 = vst.msk [vmem:[#allocation3 + $0x14] sm:$0xf] %vm373_vm5, %v354_v52  ;;  %378 = vst.msk [vmem:[#allocation3 + $0x10] sm:$0xf] %vm373_vm5, %v352_v7  ;;  %1449 = vmatmul.mubr.msk.bf16.gmra.mxu0 %vm990_vm13, %v1583_v38 }
  0xfa   : > { %1452 = vmatprep.mubr.msk.bf16.mxu0 %vm1706_vm6, %v1705_v23 }
  0xfc   : > { %v362_v43 = vpop.permute.xlu1 %361  ;;  %v360_v20 = vpop.permute.xlu0 %359  ;;  %v1584_v8 = vld [vmem:[#allocation3 + $0x18] sm:$0xff]  }
  0xfd   : > { %383 = vst.msk [vmem:[#allocation3 + $0x24] sm:$0xf] %vm373_vm5, %v362_v43  ;;  %382 = vst.msk [vmem:[#allocation3 + $0x20] sm:$0xf] %vm373_vm5, %v360_v20  ;;  %1457 = vmatmul.mubr.msk.bf16.vlgmr.msra.gmra.mxu1 %vm990_vm13, %v1584_v8 }
  0xfe   : > { %1460 = vmatprep.mubr.msk.bf16.mxu1 %vm1706_vm6, %v1705_v23 }
 0x100   : > { %v440_v42 = vpop.permute.xlu1 %439  ;;  %v438_v33 = vpop.permute.xlu0 %437 }
 0x101   : > { %465 = vst.msk [vmem:[#allocation3 + $0x14] sm:$0xf] %vm459_vm7, %v440_v42  ;;  %464 = vst.msk [vmem:[#allocation3 + $0x10] sm:$0xf] %vm459_vm7, %v438_v33 }
 0x104   : > { %v448_v40 = vpop.permute.xlu1 %447  ;;  %v446_v57 = vpop.permute.xlu0 %445 }
 0x105   : > { %469 = vst.msk [vmem:[#allocation3 + $0x24] sm:$0xf] %vm459_vm7, %v448_v40  ;;  %468 = vst.msk [vmem:[#allocation3 + $0x20] sm:$0xf] %vm459_vm7, %v446_v57 }
 0x108   : > { %v485_v46 = vpop.permute.xlu1 %484  ;;  %v483_v28 = vpop.permute.xlu0 %482 }
 0x109   : > { %510 = vst.msk [vmem:[#allocation3 + $0x14] sm:$0xf] %vm504_vm8, %v485_v46  ;;  %509 = vst.msk [vmem:[#allocation3 + $0x10] sm:$0xf] %vm504_vm8, %v483_v28 }
 0x10c   : > { %v493_v1 = vpop.permute.xlu1 %492  ;;  %v491_v23 = vpop.permute.xlu0 %490 }
 0x10d   : > { %514 = vst.msk [vmem:[#allocation3 + $0x24] sm:$0xf] %vm504_vm8, %v493_v1  ;;  %513 = vst.msk [vmem:[#allocation3 + $0x20] sm:$0xf] %vm504_vm8, %v491_v23 }
 0x110   : > { %v589_v5 = vpop.permute.xlu1 %588  ;;  %v587_v2 = vpop.permute.xlu0 %586 }
 0x111   : > { %614 = vst.msk [vmem:[#allocation3 + $0x14] sm:$0xf] %vm608_vm4, %v589_v5  ;;  %613 = vst.msk [vmem:[#allocation3 + $0x10] sm:$0xf] %vm608_vm4, %v587_v2 }
 0x114   : > { %v597_v31 = vpop.permute.xlu1 %596  ;;  %v595_v19 = vpop.permute.xlu0 %594 }
 0x115   : > { %618 = vst.msk [vmem:[#allocation3 + $0x24] sm:$0xf] %vm608_vm4, %v597_v31  ;;  %617 = vst.msk [vmem:[#allocation3 + $0x20] sm:$0xf] %vm608_vm4, %v595_v19 }
 0x118   : > { %v664_v26 = vpop.permute.xlu1 %663  ;;  %v662_v49 = vpop.permute.xlu0 %661 }
 0x119   : > { %689 = vst.msk [vmem:[#allocation3 + $0x14] sm:$0xf] %vm683_vm9, %v664_v26  ;;  %688 = vst.msk [vmem:[#allocation3 + $0x10] sm:$0xf] %vm683_vm9, %v662_v49 }
 0x11c   : > { %v672_v39 = vpop.permute.xlu1 %671  ;;  %v670_v30 = vpop.permute.xlu0 %669 }
 0x11d   : > { %693 = vst.msk [vmem:[#allocation3 + $0x24] sm:$0xf] %vm683_vm9, %v672_v39  ;;  %692 = vst.msk [vmem:[#allocation3 + $0x20] sm:$0xf] %vm683_vm9, %v670_v30 }
 0x120   : > { %v709_v4 = vpop.permute.xlu1 %708  ;;  %v707_v11 = vpop.permute.xlu0 %706 }
 0x121   : > { %734 = vst.msk [vmem:[#allocation3 + $0x14] sm:$0xf] %vm728_vm10, %v709_v4  ;;  %733 = vst.msk [vmem:[#allocation3 + $0x10] sm:$0xf] %vm728_vm10, %v707_v11 }
 0x124   : > { %v717_v45 = vpop.permute.xlu1 %716  ;;  %v715_v0 = vpop.permute.xlu0 %714 }
 0x125   : > { %738 = vst.msk [vmem:[#allocation3 + $0x24] sm:$0xf] %vm728_vm10, %v717_v45  ;;  %737 = vst.msk [vmem:[#allocation3 + $0x20] sm:$0xf] %vm728_vm10, %v715_v0 }
 0x128   : > { %v811_v60 = vpop.permute.xlu1 %810  ;;  %v809_v10 = vpop.permute.xlu0 %808 }
 0x129   : > { %836 = vst.msk [vmem:[#allocation3 + $0x14] sm:$0xf] %vm830_vm11, %v811_v60  ;;  %835 = vst.msk [vmem:[#allocation3 + $0x10] sm:$0xf] %vm830_vm11, %v809_v10 }
 0x12c   : > { %v819_v36 = vpop.permute.xlu1 %818  ;;  %v817_v12 = vpop.permute.xlu0 %816 }
 0x12d   : > { %840 = vst.msk [vmem:[#allocation3 + $0x24] sm:$0xf] %vm830_vm11, %v819_v36  ;;  %839 = vst.msk [vmem:[#allocation3 + $0x20] sm:$0xf] %vm830_vm11, %v817_v12 }
 0x130   : > { %v886_v3 = vpop.permute.xlu1 %885  ;;  %v884_v48 = vpop.permute.xlu0 %883 }
 0x131   : > { %911 = vst.msk [vmem:[#allocation3 + $0x14] sm:$0xf] %vm905_vm12, %v886_v3  ;;  %910 = vst.msk [vmem:[#allocation3 + $0x10] sm:$0xf] %vm905_vm12, %v884_v48 }
 0x134   : > { %v894_v35 = vpop.permute.xlu1 %893  ;;  %v892_v63 = vpop.permute.xlu0 %891 }
 0x135   : > { %915 = vst.msk [vmem:[#allocation3 + $0x24] sm:$0xf] %vm905_vm12, %v894_v35  ;;  %914 = vst.msk [vmem:[#allocation3 + $0x20] sm:$0xf] %vm905_vm12, %v892_v63 }
 0x138   : > { %v1585_v29 = vld [vmem:[#allocation3 + $0x10] sm:$0xff]  }
 0x139   : > { %1453 = vmatmul.mubr.msk.bf16.gmra.mxu0 %vm990_vm13, %v1585_v29 }
 0x13c   : > { %v1586_v16 = vld [vmem:[#allocation3 + $0x20] sm:$0xff]  }
 0x13d   : > { %1461 = vmatmul.mubr.msk.bf16.gmra.mxu1 %vm990_vm13, %v1586_v16 }
 0x17d   : > { %v2600_v59 = vpop.f32.mrf.mxu0 }
 0x17f   : > { %v1446_v34 = vpop.f32.mrf.mxu0 }
 0x181   : > { %v2602_v24 = vpop.f32.mrf.mxu0 }
 0x183   : > { %v1447_v44 = vpop.f32.mrf.mxu0 }
 0x1b9   : > { %v2604_v61 = vpop.f32.mrf.mxu0 }
 0x1bb   : > { %v1450_v15 = vpop.f32.mrf.mxu0 }
 0x1bd   : > { %v2606_v18 = vpop.f32.mrf.mxu0  ;;  %v2608_v58 = vpop.f32.mrf.mxu1 }
 0x1bf   : > { %v1451_v21 = vpop.f32.mrf.mxu0  ;;  %v1458_v62 = vpop.f32.mrf.mxu1 }
 0x1c1   : > { %v2610_v13 = vpop.f32.mrf.mxu1 }
 0x1c3   : > { %v1459_v56 = vpop.f32.mrf.mxu1 }
 0x1f9   : > { %v2612_v17 = vpop.f32.mrf.mxu0 }
 0x1fb   : > { %v1454_v47 = vpop.f32.mrf.mxu0 }
 0x1fd   : > { %v2614_v6 = vpop.f32.mrf.mxu0  ;;  %v2616_v53 = vpop.f32.mrf.mxu1 }
 0x1ff   : > { %v1455_v14 = vpop.f32.mrf.mxu0  ;;  %v1462_v9 = vpop.f32.mrf.mxu1  ;;  %1086 = sbr.rel (%p1368_p1) target bundleno = 521 (0x209), region = 36 }
 0x201   : > { %v2618_v22 = vpop.f32.mrf.mxu1 }
 0x203   : > { %v1463_v37 = vpop.f32.mrf.mxu1 }
 0x204   : > { %1087 = vst [vmem:[#allocation2 + $0x30] sm:$0xff] %v2600_v59  ;;  %1088 = vst [vmem:[#allocation2] sm:$0xff] %v2602_v24 }
 0x205   : > { %1089 = vst [vmem:[#allocation2 + $0x18] sm:$0xff] %v2604_v61  ;;  %1090 = vst [vmem:[#allocation2 + $0x10] sm:$0xff] %v2606_v18 }
 0x206   : > { %1091 = vst [vmem:[#allocation2 + $0x48] sm:$0xff] %v2612_v17  ;;  %1092 = vst [vmem:[#allocation2 + $0x28] sm:$0xff] %v2614_v6 }
 0x207   : > { %1093 = vst [vmem:[#allocation2 + $0x8] sm:$0xff] %v2608_v58  ;;  %1094 = vst [vmem:[#allocation2 + $0x20] sm:$0xff] %v2610_v13 }
 0x208   : > { %1095 = vst [vmem:[#allocation2 + $0x40] sm:$0xff] %v2616_v53  ;;  %1096 = vst [vmem:[#allocation2 + $0x38] sm:$0xff] %v2618_v22 }
 0x209 PF: > { %p1097_p2 = scmp.gt.s32.totalorder %s1671_s15, 0  ;;  %p1098_p3 = scmp.lt.s32.totalorder %s1671_s15, 2 }
 0x20b   : > { %p1099_p4 = pnand %p1098_p3, %p1097_p2 }
 0x20d   : > { %1102 = sbr.rel (%p1099_p4) target bundleno = 538 (0x21a), region = 40 }
 0x212   : > { %v1103_v50 = vld [vmem:[#allocation2 + $0x30] sm:$0xff]  ;;  %v1104_v55 = vld [vmem:[#allocation2] sm:$0xff]  ;;  %v1105_v41 = vld [vmem:[#allocation2 + $0x18] sm:$0xff] }
 0x213   : > { %v1113_v25 = vadd.f32 %v1103_v50, %v2600_v59  ;;  %v1114_v32 = vadd.f32 %v1104_v55, %v2602_v24  ;;  %v1115_v51 = vadd.f32 %v1105_v41, %v2604_v61  ;;  %v1106_v54 = vld [vmem:[#allocation2 + $0x10] sm:$0xff]  ;;  %v1107_v27 = vld [vmem:[#allocation2 + $0x48] sm:$0xff]  ;;  %v1110_v8 = vld [vmem:[#allocation2 + $0x20] sm:$0xff] }
 0x214   : > { %v1108_v52 = vld [vmem:[#allocation2 + $0x28] sm:$0xff]  ;;  %v1116_v7 = vadd.f32 %v1106_v54, %v2606_v18  ;;  %v1117_v38 = vadd.f32 %v1107_v27, %v2612_v17  ;;  %v1111_v42 = vld [vmem:[#allocation2 + $0x40] sm:$0xff]  ;;  %v1120_v40 = vadd.f32 %v1110_v8, %v2610_v13  ;;  %v1112_v46 = vld [vmem:[#allocation2 + $0x38] sm:$0xff] }
 0x215   : > { %v1118_v43 = vadd.f32 %v1108_v52, %v2614_v6  ;;  %v1109_v20 = vld [vmem:[#allocation2 + $0x8] sm:$0xff]  ;;  %1123 = vst [vmem:[#allocation2 + $0x30] sm:$0xff] %v1113_v25  ;;  %1124 = vst [vmem:[#allocation2] sm:$0xff] %v1114_v32  ;;  %v1121_v57 = vadd.f32 %v1111_v42, %v2616_v53  ;;  %v1122_v28 = vadd.f32 %v1112_v46, %v2618_v22 }
 0x216   : > { %1125 = vst [vmem:[#allocation2 + $0x18] sm:$0xff] %v1115_v51  ;;  %v1119_v33 = vadd.f32 %v1109_v20, %v2608_v58  ;;  %1126 = vst [vmem:[#allocation2 + $0x10] sm:$0xff] %v1116_v7 }
 0x217   : > { %1127 = vst [vmem:[#allocation2 + $0x48] sm:$0xff] %v1117_v38  ;;  %1128 = vst [vmem:[#allocation2 + $0x28] sm:$0xff] %v1118_v43 }
 0x218   : > { %1129 = vst [vmem:[#allocation2 + $0x8] sm:$0xff] %v1119_v33  ;;  %1130 = vst [vmem:[#allocation2 + $0x20] sm:$0xff] %v1120_v40 }
 0x219   : > { %1131 = vst [vmem:[#allocation2 + $0x40] sm:$0xff] %v1121_v57  ;;  %1132 = vst [vmem:[#allocation2 + $0x38] sm:$0xff] %v1122_v28 }
 0x21a PF: > { %p1369_p5 = scmp.ne.s32.totalorder %s1671_s15, 2 }
 0x21c   : > { %1136 = sbr.rel (%p1369_p5) target bundleno = 561 (0x231), region = 44 }
 0x221   : > { %v1137_v1 = vld [vmem:[#allocation2 + $0x30] sm:$0xff]  ;;  %v1138_v23 = vld [vmem:[#allocation2] sm:$0xff]  ;;  %v1139_v19 = vld [vmem:[#allocation2 + $0x18] sm:$0xff] }
 0x222   : > { %v1370_v5 = vld [vmem:[%s2738_s2] ss:$0 sm:$0xff]  ;;  %v1147_v2 = vadd.f32 %v1137_v1, %v2600_v59  ;;  %v1148_v31 = vadd.f32 %v1138_v23, %v2602_v24  ;;  %v1140_v26 = vld [vmem:[#allocation2 + $0x10] sm:$0xff]  ;;  %v1141_v49 = vld [vmem:[#allocation2 + $0x48] sm:$0xff]  ;;  %v1149_v39 = vadd.f32 %v1139_v19, %v2604_v61 }
 0x223   : > { %v1150_v30 = vadd.f32 %v1140_v26, %v2606_v18  ;;  %v1142_v4 = vld [vmem:[#allocation2 + $0x28] sm:$0xff]  ;;  %v1151_v11 = vadd.f32 %v1141_v49, %v2612_v17  ;;  %v1144_v0 = vld [vmem:[#allocation2 + $0x20] sm:$0xff]  ;;  %v1146_v44 = vld [vmem:[#allocation2 + $0x38] sm:$0xff] }
 0x224   : > { %v1143_v45 = vld [vmem:[#allocation2 + $0x8] sm:$0xff]  ;;  %v1164_v60 = vadd.f32 %v1370_v5, %v1147_v2  ;;  %v1165_v10 = vadd.f32 %v1370_v5, %v1148_v31  ;;  %v1152_v36 = vadd.f32 %v1142_v4, %v2614_v6  ;;  %v1166_v3 = vadd.f32 %v1370_v5, %v1149_v39  ;;  %v1145_v29 = vld [vmem:[#allocation2 + $0x40] sm:$0xff] }
 0x225   : > { %v1153_v12 = vadd.f32 %v1143_v45, %v2608_v58  ;;  %v1167_v48 = vadd.f32 %v1370_v5, %v1150_v30  ;;  %v1168_v35 = vadd.f32 %v1370_v5, %v1151_v11  ;;  %v1154_v63 = vadd.f32 %v1144_v0, %v2610_v13 }
 0x226   : > { %v1174_v16 = vmax.f32 %v1164_v60, 0.0  ;;  %v1175_v59 = vmax.f32 %v1165_v10, 0.0  ;;  %v1169_v34 = vadd.f32 %v1370_v5, %v1152_v36  ;;  %v1176_v61 = vmax.f32 %v1166_v3, 0.0 }
 0x227   : > { %v1170_v24 = vadd.f32 %v1370_v5, %v1153_v12  ;;  %v1177_v15 = vmax.f32 %v1167_v48, 0.0  ;;  %v1178_v18 = vmax.f32 %v1168_v35, 0.0  ;;  %v1171_v21 = vadd.f32 %v1370_v5, %v1154_v63 }
 0x228   : > { %v1398_v58 = vpack.c.bf16 %v1175_v59, %v1174_v16  ;;  %v1179_v62 = vmax.f32 %v1169_v34, 0.0  ;;  %v1155_v13 = vadd.f32 %v1145_v29, %v2616_v53  ;;  %v1156_v6 = vadd.f32 %v1146_v44, %v2618_v22 }
 0x229   : > { %v1180_v56 = vmax.f32 %v1170_v24, 0.0  ;;  %v1403_v17 = vpack.c.bf16 %v1177_v15, %v1176_v61  ;;  %v1181_v47 = vmax.f32 %v1171_v21, 0.0 }
 0x22a   : > { %1399 = vst [vmem:[%s2621_s30] sm:$0xff] %v1398_v58   ;;  %v1408_v14 = vpack.c.bf16 %v1179_v62, %v1178_v18  ;;  %v1172_v9 = vadd.f32 %v1370_v5, %v1155_v13  ;;  %v1173_v50 = vadd.f32 %v1370_v5, %v1156_v6 }
 0x22b   : > { %1420 = vst [vmem:[%s2621_s30 + $0x8] sm:$0xff] %v1403_v17   ;;  %v1413_v37 = vpack.c.bf16 %v1181_v47, %v1180_v56 }
 0x22c   : > { %1421 = vst [vmem:[%s2621_s30 + $0x10] sm:$0xff] %v1408_v14   ;;  %v1182_v55 = vmax.f32 %v1172_v9, 0.0  ;;  %v1183_v41 = vmax.f32 %v1173_v50, 0.0 }
 0x22d   : > { %1422 = vst [vmem:[%s2621_s30 + $0x18] sm:$0xff] %v1413_v37  }
 0x22e   : > { %v1418_v25 = vpack.c.bf16 %v1183_v41, %v1182_v55 }
 0x230   : > { %1423 = vst [vmem:[%s2621_s30 + $0x20] sm:$0xff] %v1418_v25  }
 0x231 PF: > { %s1477_s15 = smul.u32 10, %s1675_s16  ;;  %s1250_s10 = sshll.u32 %s2621_s30, 4  ;;  %s2668_s10 = int_to_ptr.vmem [resolvable:$true] %s1250_s10 }
 0x232   : > { %s1478_s8 = smul.u32 80, %s1679_s17  ;;  %s2792_s4 = sand.u32 1, %s1663_s13  }
 0x233   : > { %s2677_s5 = scalar_lea.sflag [#allocation5], %s2792_s4  ;;  %s1587_s9 = scalar_lea.vmem %s2668_s10, 640 }
 0x234   : > { %s1247_s23 = sadd.s32 %s1478_s8, %s1477_s15  ;;  %p1588_p8 = scmp.ne.s32.totalorder %s2668_s10, %s1587_s9 }
 0x235   : > { %s1381_s29 = sshll.u32 %s1247_s23, 6  ;;  %s1707_s16 = smov [#allocation4]  }
 0x236   : > { %s2673_s22 = scalar_lea.hbm %s2739_s3, %s1381_s29  ;;  %p1589_p9 = pnand %p1588_p8, %p1791_p6 }
 0x237   : > { %s1591_s17 = sshll.u32 %s1707_s16, 4  ;;  %s1592_s17 = int_to_ptr.vmem [resolvable:$false] %s1591_s17 }
 0x238   : > { %p1590_p10 = pneg %p1589_p9  ;;  %s1593_s30 = scalar_lea.vmem %s1592_s17, 1280 }
 0x239   : > { %p1594_p11 = scmp.lt.s32.totalorder %s2668_s10, %s1592_s17  ;;  %p1595_p12 = scmp.lt.s32.totalorder %s1593_s30, %s1587_s9 }
 0x23b   : > { %p1596_p13 = por %p1595_p12, %p1594_p11 }
 0x23d   : > { %p1597_p0 = pnand %p1596_p13, %p1590_p10 }
 0x23f   : > { %1600 = shalt.err (!%p1597_p0)
}
 0x240   : > { %s1601_s15 = scalar_lea.hbm %s2673_s22, 640  ;;  %s1605_s29 = scalar_lea.hbm %s2739_s3, 10240 }
 0x241   : > { %p1602_p1 = scmp.ne.s32.totalorder %s2673_s22, %s1601_s15  ;;  %p1606_p4 = scmp.lt.s32.totalorder %s2673_s22, %s2739_s3 }
 0x242   : > { %p1607_p5 = scmp.lt.s32.totalorder %s1605_s29, %s1601_s15 }
 0x243   : > { %p1603_p2 = pnand %p1602_p1, %p1791_p6 }
 0x244   : > { %p1608_p8 = por %p1607_p5, %p1606_p4 }
 0x245   : > { %p1604_p3 = pneg %p1603_p2 }
 0x247   : > { %p1609_p9 = pnand %p1608_p8, %p1604_p3 }
 0x249   : > { %1612 = shalt.err (!%p1609_p9)
}
 0x24a   : > { %s1708_s9 = smov 4   ;;  %s2793_s4 = smov 64  }
 0x24b   : > { %1479 = dma.vmem_to_hbm [thread:$0]  (%p1791_p6), %s2668_s10, 640, %s2673_s22, %s2677_s5, %s2793_s4, %s2793_s4, %s1708_s9  }
 0x24c PF: > { %p1485_p10 = scmp.ge.s32.totalorder %s1695_s21, 2  ;;  %s1265_s16 = sand.u32 1, %s1659_s12  }
 0x24d   : > { %s1266_s17 = scalar_lea.sflag [#allocation5], %s1265_s16 }
 0x24e   : > { %p1482_p11 = pnand %p1485_p10, %p1798_p7 }
 0x250   : > { %p1483_p12 = pneg %p1482_p11 }
 0x252   : > { %1654 = dma.done.wait (%p1483_p12), %s1266_s17, 640  }
 0x253   : > { %1656 = vsyncadd (%p1483_p12), %s1266_s17, 4294966656  ;;  %s16_s21 = sadd.s32 1, %s1695_s21   ;;  %s2794_s12 = smov %s1663_s13 }
 0x254   : > { %p13_p13 = scmp.ge.s32.totalorder %s16_s21, 50   ;;  %s2795_s13 = smov %s1667_s14 }
 0x255   : > { %s2796_s14 = smov %s1812_s6  ;;  %s2797_s15 = smov %s1683_s18 }
 0x256   : > { %s2798_s16 = smov %s1687_s19  ;;  %s2799_s17 = smov %s1691_s20 }
 0x257   : > { %s2800_s18 = smov %s2804_s24  ;;  %s2801_s19 = smov %s2808_s25 }
 0x258   : > { %s2802_s20 = smov %s2812_s26  ;;  %15 = sbr.rel (!%p13_p13) target bundleno = 6 (0x6), region = 80 }
 0x25d   :  { %1271 = vsyncpa [#allocation5], 1 }
 0x25e   :  { %1273 = vsyncpa [#allocation5 + $0x1], 1 }

// kernel: tpu_custom_call.1
= control target key start
LH: loop header
LB: loop body
LE: loop exit
PB: predicated region body
PF: predicated region fallthrough
CT: control target
= control target key end

     0   :  { %8 = vsyncpa [#allocation4], 0  ;;  %s2938_s0 = inlined_call_operand.vmem [shape: bf16[2,10,110,8], index: 0, kind: input, shape index: {}]   ;;  %s2939_s1 = inlined_call_operand.vmem [shape: bf16[3,72,128], index: 1, kind: input, shape index: {}]   ;;  %s2940_s2 = inlined_call_operand.vmem [shape: f32[1,128], index: 2, kind: input, shape index: {}]   ;;  %s2941_s3 = inlined_call_operand.hbm [shape: bf16[2,8,80,128], index: 3, kind: output, shape index: {}]  }
   0x1   :  { %10 = vsyncpa [#allocation4 + $0x1], 0  ;;  %s2235_s12 = smov 0   ;;  %s2237_s13 = smov 0  }
   0x2   :  { %s2239_s14 = smov 0   ;;  %s2241_s15 = smov 0  }
   0x3   :  { %s2243_s16 = smov 0   ;;  %s2245_s17 = smov 0  }
   0x4   :  { %s2247_s18 = smov 0   ;;  %s2249_s19 = smov 0  }
   0x5   :  { %s2251_s20 = smov 0   ;;  %s2253_s21 = smov 0  }
   0x6 LB: > { %s1614_s22 = sadd.s32 4294967295, %s2208_s21   ;;  %s1615_s23 = sadd.s32 4294967294, %s2208_s21   ;;  %s2208_s21 = sphi %s2253_s21, %s16_s21   ;;  %s2204_s20 = sphi %s2251_s20, %s2952_s20   ;;  %s2200_s19 = sphi %s2249_s19, %s2951_s19   ;;  %s2196_s18 = sphi %s2247_s18, %s2950_s18   ;;  %s2192_s17 = sphi %s2245_s17, %s2949_s17   ;;  %s2188_s16 = sphi %s2243_s16, %s2948_s16   ;;  %s2184_s15 = sphi %s2241_s15, %s2947_s15   ;;  %s2180_s14 = sphi %s2239_s14, %s2946_s14   ;;  %s2176_s13 = sphi %s2237_s13, %s2945_s13   ;;  %s2172_s12 = sphi %s2235_s12, %s2944_s12  }
   0x7   : > { %s28_s24 = sadd.s32 1, %s2196_s18  ;;  %s31_s25 = sadd.s32 1, %s2200_s19 }
   0x8   : > { %p29_p0 = scmp.ge.s32.totalorder %s28_s24, 3  ;;  %s35_s26 = sadd.s32 1, %s2204_s20 }
   0x9   : > { %p126_p1 = scmp.ne.s32.totalorder %s2180_s14, %s2176_s13  ;;  %p127_p2 = scmp.eq.s32.totalorder %s1614_s22, 47 }
   0xa   : > { %s2954_s24 = smov (%p29_p0, %s28_s24), 0  ;;  %s2956_s25 = smov (!%p29_p0, %s31_s25), %s2200_s19 }
   0xb   : > { %p132_p3 = scmp.ne.s32.totalorder %s2176_s13, %s2172_s12  ;;  %p33_p4 = scmp.ge.s32.totalorder %s2956_s25, 8 }
   0xc   : > { %p133_p5 = scmp.eq.s32.totalorder %s1615_s23, 47  ;;  %p2297_p6 = por %p127_p2, %p126_p1 }
   0xd   : > { %s2958_s25 = smov (%p33_p4, %s2956_s25), 0  ;;  %s2960_s26 = smov (!%p33_p4, %s35_s26), %s2204_s20 }
   0xe   : > { %p2304_p7 = por %p133_p5, %p132_p3  ;;  %p1618_p8 = scmp.ge.s32.totalorder %s2208_s21, 1 }
   0xf   : > { %p37_p9 = scmp.ge.s32.totalorder %s2960_s26, 2  ;;  %p171_p10 = scmp.lt.s32.totalorder %s2208_s21, 49 }
  0x10   : > { %s112_s29 = ssub.s32 %s2200_s19, %s2958_s25  ;;  %s116_s5 = sadd.s32 1, %s2180_s14 }
  0x11   : > { %s2962_s26 = smov (%p37_p9, %s2960_s26), 0  ;;  %p172_p11 = pnand %p1618_p8, %p171_p10 }
  0x12   : > { %s111_s30 = ssub.s32 %s2204_s20, %s2962_s26  ;;  %s197_s7 = sand.u32 (!%p172_p11), 1, %s2176_s13  }
  0x13   : > { %s113_s4 = sor.u32 %s112_s29, %s111_s30  ;;  %175 = sbr.rel (%p172_p11) target bundleno = 489 (0x1e9), region = 32 }
  0x14   : > { %p114_p12 = scmp.eq.s32.totalorder %s113_s4, 0  ;;  %s1696_s8 = smul.u32 (!%p172_p11), 36, %s2184_s15 }
  0x15   : > { %s2324_s9 = smul.u32 (!%p172_p11), 40, %s197_s7  ;;  %s200_s10 = sadd.s32 (!%p172_p11), %s2184_s15, %s2188_s16 }
  0x16   : > { %s2318_s6 = scalar_select %p114_p12, %s2180_s14, %s116_s5  }
  0x17   : > { %s2333_s23 = scalar_lea.vmem (!%p172_p11), %s2939_s1, %s1696_s8  ;;  %p201_p13 = scmp.lt.s32.totalorder (!%p172_p11), %s2192_s17, 1 }
  0x18   : > { %v2210_v0 = vmov 0.0   ;;  %vm319_vm0 = vcmask 1043456   ;;  %vm2211_vm1 = vmmov 0   ;;  %v229_v1 = vld [vmem:[%s2333_s23 + $0x4] sm:$0xf]  ;;  %p203_p0 = scmp.lt.s32.totalorder %s200_s10, 9 }
  0x19   : > { %1790 = vmatprep.subr.bf16.mxu0 %v2210_v0  ;;  %1988 = vmatprep.subr.bf16.mxu1 %v2210_v0  ;;  %v321_v2 = vsel %vm319_vm0, %v229_v1, 0  ;;  %s202_s29 = scalar_select %p201_p13, %s2192_s17, 1  ;;  %v873_v3 = vld [vmem:[%s2333_s23 + $0x14] sm:$0xf]  ;;  %v987_v5 = vld [vmem:[%s2333_s23 + $0x18] sm:$0xf] }
  0x1a   : > { %1792 = vmatprep.mubr.msk.bf16.mxu0 %vm2211_vm1, %v2210_v0  ;;  %1804 = vmatprep.mubr.msk.bf16.mxu1 %vm2211_vm1, %v2210_v0  ;;  %s2964_s10 = smov (!%p203_p0, %s200_s10), 9  ;;  %v2347_v4 = vsel %vm319_vm0, %v873_v3, 0  ;;  %v1104_v6 = vld [vmem:[%s2333_s23 + $0x1c] sm:$0xf]  ;;  %v2352_v7 = vsel %vm319_vm0, %v987_v5, 0  ;;  %vm303_vm3 = vcmask 64512  }
  0x1b   : > { %1791 = vmatpush3.bf16.msra.mxu0 %v321_v2  ;;  %1989 = vmatpush3.bf16.msra.mxu1 %v321_v2  ;;  %s1992_s30 = smul.u32 140, %s202_s29  ;;  %v2355_v8 = vsel %vm319_vm0, %v1104_v6, 0  ;;  %v1240_v9 = vld [vmem:[%s2333_s23 + $0x20] sm:$0xf]  ;;  %v482_v34 = vld [vmem:[%s2333_s23 + $0x8] sm:$0xf] }
  0x1c   : > { %1834 = vmatprep.subr.bf16.mxu0 %v2210_v0  ;;  %1812 = vmatprep.subr.bf16.mxu1 %v2210_v0  ;;  %s1991_s4 = smul.u32 14, %s2964_s10  ;;  %v2359_v10 = vsel %vm319_vm0, %v1240_v9, 0  ;;  %vm258_vm2 = vsmask.f32 7424  ;;  %v228_v40 = vld [vmem:[%s2333_s23] sm:$0xf] }
  0x1d   : > { %v511_v44 = vsel %vm319_vm0, %v482_v34, 0  ;;  %v407_v51 = vsel %vm319_vm0, %v228_v40, 0  ;;  %v596_v57 = vld [vmem:[%s2333_s23 + $0xc] sm:$0xf]  ;;  %v717_v60 = vld [vmem:[%s2333_s23 + $0x10] sm:$0xf] }
  0x1e   : > { %s207_s5 = sadd.s32 %s1992_s30, %s1991_s4  ;;  %v632_v1 = vsel %vm319_vm0, %v596_v57, 0  ;;  %vm483_vm4 = vcmask 1046528   ;;  %v2456_v5 = vsel %vm319_vm0, %v717_v60, 0  ;;  %vm718_vm5 = vsmask.f32 6400  ;;  %s2825_s23 = scalar_lea.vmem [#allocation3], %s2324_s9 }
  0x1f   : > { %s1619_s8 = sshll.u32 %s207_s5, 2  ;;  %vm874_vm6 = vcmask 1045504   ;;  %vm1105_vm7 = vsmask.f32 5376  ;;  %vm1241_vm8 = vcmask 1044480   ;;  %p1680_p1 = scmp.ne.s32.totalorder %s2184_s15, 0 }
  0x20   : > { %s2364_s10 = scalar_lea.vmem %s2938_s0, %s1619_s8 }
  0x21   : > { %v212_v11 = vld [vmem:[%s2364_s10] sm:$0xf]  ;;  %v2368_v12 = vld [vmem:[%s2364_s10 + $0x4] sm:$0xf]  ;;  %v2371_v13 = vld [vmem:[%s2364_s10 + $0x8] sm:$0xf] }
  0x22   : > { %v2374_v14 = vld [vmem:[%s2364_s10 + $0xc] sm:$0xf]  ;;  %v2377_v15 = vcombine.low %v212_v11, %v2368_v12  ;;  %v218_v16 = vld [vmem:[%s2364_s10 + $0x18] sm:$0xf]  ;;  %v219_v17 = vld [vmem:[%s2364_s10 + $0x1c] sm:$0xf] }
  0x23   : > { %v2383_v18 = vcombine.low %v2371_v13, %v2374_v14  ;;  %v220_v19 = vld [vmem:[%s2364_s10 + $0x20] sm:$0xf]  ;;  %v221_v20 = vld [vmem:[%s2364_s10 + $0x24] sm:$0xf]  ;;  %v2387_v21 = vcombine.low %v218_v16, %v219_v17  ;;  %v2390_v22 = vld [vmem:[%s2364_s10 + $0x10] sm:$0xf] }
  0x24   : > { %v260_v23 = vshrl.u32 %v2377_v15, 16  ;;  %v262_v24 = vshll.u32 %v2377_v15, 16  ;;  %v2394_v25 = vcombine.low %v220_v19, %v221_v20  ;;  %v217_v26 = vld [vmem:[%s2364_s10 + $0x14] sm:$0xf]  ;;  %v222_v27 = vld [vmem:[%s2364_s10 + $0x28] sm:$0xf]  ;;  %v2448_v63 = vcombine.low %v219_v17, %v220_v19 }
  0x25   : > { %v267_v28 = vshll.u32 %v2383_v18, 16  ;;  %v283_v29 = vshll.u32 %v2387_v21, 16  ;;  %v287_v30 = vshrl.u32 %v2387_v21, 16  ;;  %v2402_v31 = vcombine.low %v2390_v22, %v217_v26  ;;  %v223_v47 = vld [vmem:[%s2364_s10 + $0x2c] sm:$0xf] }
  0x26   : > { %v264_v32 = vrot.slane %v262_v24, 1  ;;  %v291_v33 = vshll.u32 %v2394_v25, 16  ;;  %v2406_v35 = vcombine.low %v222_v27, %v222_v27  ;;  %v271_v41 = vshrl.u32 %v2383_v18, 16 }
  0x27   : > { %v269_v36 = vrot.slane %v267_v28, 1  ;;  %v2410_v37 = vrot.slane %v283_v29, 1  ;;  %v275_v42 = vshll.u32 %v2402_v31, 16  ;;  %v295_v45 = vshrl.u32 %v2394_v25, 16 }
  0x28   : > { %v265_v38 = vor.u32 %v264_v32, %v260_v23  ;;  %v293_v39 = vrot.slane %v291_v33, 1  ;;  %v299_v48 = vshll.u32 %v2406_v35, 16  ;;  %v2425_v49 = vcombine.low %v221_v20, %v222_v27 }
  0x29   : > { %v289_v43 = vor.u32 %v287_v30, %v2410_v37  ;;  %v2430_v52 = vcombine.low %v222_v27, %v223_v47  ;;  %v273_v53 = vor.u32 %v271_v41, %v269_v36  ;;  %v277_v54 = vrot.slane %v275_v42, 1 }
  0x2a   : > { %v270_v46 = vsel %vm258_vm2, %v265_v38, %v269_v36  ;;  %v297_v55 = vor.u32 %v295_v45, %v293_v39  ;;  %v301_v56 = vrot.slane %v299_v48, 1  ;;  %v279_v59 = vshrl.u32 %v2402_v31, 16 }
  0x2b   : > { %1793 = vmatmul.mubr.msk.bf16.vlgmr.msra.gmra.mxu0 %vm303_vm3, %v270_v46  ;;  %v294_v50 = vsel %vm258_vm2, %v289_v43, %v293_v39  ;;  %v278_v58 = vsel %vm258_vm2, %v273_v53, %v277_v54  ;;  %v2445_v61 = vcombine.low %v217_v26, %v218_v16  ;;  %v2452_v3 = vrot.slane %v267_v28, 3 }
  0x2c   : > { %1805 = vmatmul.mubr.msk.bf16.vlgmr.msra.gmra.mxu1 %vm303_vm3, %v294_v50  ;;  %1835 = vmatpush3.bf16.msra.mxu0 %v511_v44  ;;  %v302_v62 = vsel %vm258_vm2, %v297_v55, %v301_v56  ;;  %v610_v9 = vrot.slane %v2448_v63, 1  ;;  %v2460_v11 = vrot.slane %v271_v41, 2  ;;  %v281_v16 = vor.u32 %v279_v59, %v277_v54 }
  0x2d   : > { %1796 = vmatprep.mubr.msk.bf16.mxu0 %vm2211_vm1, %v2210_v0  ;;  %1808 = vmatprep.mubr.msk.bf16.mxu1 %vm2211_vm1, %v2210_v0  ;;  %v737_v2 = vshrl.u32 %v2445_v61, 16  ;;  %v608_v6 = vrot.slane %v2445_v61, 1  ;;  %v740_v17 = vshll.u32 %v2445_v61, 16  ;;  %v612_v19 = vrot.slane %v2425_v49, 1 }
  0x2e   : > { %1813 = vmatpush3.bf16.msra.mxu1 %v407_v51  ;;  %1878 = vmatprep.subr.bf16.mxu0 %v2210_v0  ;;  %v1110_v20 = vrot.slane %v275_v42, 3  ;;  %v746_v26 = vshrl.u32 %v2448_v63, 16  ;;  %v749_v32 = vshll.u32 %v2448_v63, 16  ;;  %v1647_v34 = vcombine.low %v223_v47, %v223_v47 }
  0x2f   : > { %1856 = vmatprep.subr.bf16.mxu1 %v2210_v0  ;;  %v2472_v23 = vsel %vm483_vm4, %v608_v6, %v610_v9  ;;  %v739_v24 = vrot.slane %v737_v2, 1  ;;  %v742_v27 = vrot.slane %v740_v17, 2  ;;  %v2476_v28 = vsel %vm483_vm4, %v610_v9, %v612_v19 }
  0x30   : > { %v484_v36 = vrot.slane %v2377_v15, 1  ;;  %v748_v38 = vrot.slane %v746_v26, 1  ;;  %v755_v39 = vshrl.u32 %v2425_v49, 16  ;;  %v758_v40 = vshll.u32 %v2425_v49, 16 }
  0x31   : > { %v286_v41 = vsel %vm258_vm2, %v281_v16, %v2410_v37  ;;  %v751_v42 = vrot.slane %v749_v32, 2  ;;  %v614_v43 = vrot.slane %v1647_v34, 1  ;;  %v764_v44 = vshrl.u32 %v1647_v34, 16  ;;  %v2505_v16 = vld [vmem:[%s2364_s10 + $0x30] ss:$0 sps:$4 sm:$0xff]  }
  0x32   : > { %v485_v46 = vrot.slane %v2383_v18, 1  ;;  %v757_v48 = vrot.slane %v755_v39, 1  ;;  %v760_v50 = vrot.slane %v758_v40, 2  ;;  %v767_v51 = vshll.u32 %v1647_v34, 16 }
  0x33   : > { %1797 = vmatmul.mubr.msk.bf16.gmra.mxu0 %vm303_vm3, %v278_v58  ;;  %v2485_v47 = vor.u32 %v742_v27, %v739_v24  ;;  %v752_v53 = vor.u32 %v751_v42, %v748_v38  ;;  %v2488_v54 = vsel %vm483_vm4, %v612_v19, %v614_v43  ;;  %v766_v55 = vrot.slane %v764_v44, 1 }
  0x34   : > { %1809 = vmatmul.mubr.msk.bf16.gmra.mxu1 %vm303_vm3, %v302_v62  ;;  %1800 = vmatprep.mubr.msk.bf16.mxu0 %vm2211_vm1, %v2210_v0  ;;  %v487_v37 = vrot.slane %v2402_v31, 1  ;;  %v761_v56 = vor.u32 %v760_v50, %v757_v48  ;;  %v769_v57 = vrot.slane %v767_v51, 2  ;;  %v878_v58 = vrot.slane %v2445_v61, 2 }
  0x35   : > { %1814 = vmatprep.mubr.msk.bf16.mxu1 %vm2211_vm1, %v2210_v0  ;;  %v2499_v60 = vsel %vm718_vm5, %v2485_v47, %v752_v53  ;;  %v992_v62 = vrot.slane %v2383_v18, 2  ;;  %v993_v2 = vrot.slane %v2402_v31, 2  ;;  %v880_v9 = vrot.slane %v2448_v63, 2 }
  0x36   : > { %v1109_v17 = vrot.slane %v279_v59, 2  ;;  %v770_v19 = vor.u32 %v769_v57, %v766_v55  ;;  %v995_v24 = vrot.slane %v2387_v21, 2  ;;  %v486_v26 = vsel %vm483_vm4, %v484_v36, %v485_v46 }
  0x37   : > { %v2518_v63 = vsel %vm874_vm6, %v992_v62, %v993_v2  ;;  %v2523_v59 = vsel %vm874_vm6, %v878_v58, %v880_v9  ;;  %v997_v36 = vrot.slane %v2394_v25, 2  ;;  %v884_v38 = vrot.slane %v1647_v34, 2 }
  0x38   : > { %v2527_v27 = vsel %vm718_vm5, %v761_v56, %v770_v19  ;;  %v2530_v32 = vsel %vm874_vm6, %v993_v2, %v995_v24  ;;  %v999_v40 = vrot.slane %v2430_v52, 2  ;;  %v1108_v43 = vor.u32 %v2452_v3, %v2460_v11 }
  0x39   : > { %v2539_v42 = vsel %vm874_vm6, %v995_v24, %v997_v36  ;;  %v1111_v44 = vor.u32 %v1110_v20, %v1109_v17  ;;  %v1113_v50 = vrot.slane %v287_v30, 2  ;;  %v1114_v51 = vrot.slane %v283_v29, 3 }
  0x3a   : > { %v2547_v34 = vsel %vm874_vm6, %v997_v36, %v999_v40  ;;  %v1242_v3 = vrot.slane %v2383_v18, 3  ;;  %v1243_v11 = vrot.slane %v2402_v31, 3  ;;  %v1117_v30 = vrot.slane %v295_v45, 2 }
  0x3b   : > { %1801 = vmatmul.mubr.msk.bf16.gmra.mxu0 %vm303_vm3, %v286_v41  ;;  %v1001_v41 = vrot.slane %v2505_v16, 2  ;;  %v1115_v20 = vor.u32 %v1114_v51, %v1113_v50  ;;  %v1118_v29 = vrot.slane %v291_v33, 3  ;;  %v1245_v55 = vrot.slane %v2387_v21, 3 }
  0x3c   : > { %1815 = vmatmul.mubr.msk.bf16.vlgmr.msra.gmra.mxu1 %vm303_vm3, %v2377_v15  ;;  %1836 = vmatprep.mubr.msk.bf16.mxu0 %vm2211_vm1, %v2210_v0  ;;  %v2510_v15 = vsel %vm718_vm5, %v752_v53, %v761_v56  ;;  %v2558_v53 = vsel %vm1105_vm7, %v1108_v43, %v1111_v44  ;;  %v2575_v56 = vsel %vm1241_vm8, %v1242_v3, %v1243_v11  ;;  %v1125_v57 = vshll.u32 %v2430_v52, 16 }
  0x3d   : > { %1818 = vmatprep.mubr.msk.bf16.mxu1 %vm2211_vm1, %v2210_v0  ;;  %1857 = vmatpush3.bf16.msra.mxu1 %v632_v1  ;;  %v882_v1 = vrot.slane %v2425_v49, 2  ;;  %v2550_v48 = vsel %vm874_vm6, %v999_v40, %v1001_v41  ;;  %v2581_v45 = vsel %vm1105_vm7, %v1111_v44, %v1115_v20  ;;  %v1119_v33 = vor.u32 %v1118_v29, %v1117_v30 }
  0x3e   : > { %1900 = vmatprep.subr.bf16.mxu1 %v2210_v0  ;;  %v2584_v62 = vsel %vm1241_vm8, %v1243_v11, %v1245_v55  ;;  %v488_v17 = vsel %vm483_vm4, %v485_v46, %v487_v37  ;;  %v1131_v46 = vshrl.u32 %v2505_v16, 16  ;;  %v1249_v50 = vrot.slane %v2430_v52, 3 }
  0x3f   : > { %v2534_v39 = vsel %vm874_vm6, %v880_v9, %v882_v1  ;;  %v2542_v49 = vsel %vm874_vm6, %v882_v1, %v884_v38  ;;  %v1127_v9 = vrot.slane %v1125_v57, 3  ;;  %v2592_v19 = vsel %vm1105_vm7, %v1115_v20, %v1119_v33 }
  0x40   : > { %v1134_v38 = vshll.u32 %v2505_v16, 16  ;;  %v1133_v40 = vrot.slane %v1131_v46, 2  ;;  %v1642_v20 = vcombine.low %v2368_v12, %v2371_v13  ;;  %v493_v30 = vrot.slane %v2406_v35, 1 }
  0x42   : > { %v1136_v41 = vrot.slane %v1134_v38, 3  ;;  %v723_v29 = vshll.u32 %v1642_v20, 16  ;;  %v605_v12 = vrot.slane %v1642_v20, 1 }
  0x43   : > { %1837 = vmatmul.mubr.msk.bf16.vlgmr.msra.gmra.mxu0 %vm303_vm3, %v486_v26  ;;  %v1247_v26 = vrot.slane %v2394_v25, 3 }
  0x44   : > { %1819 = vmatmul.mubr.msk.bf16.gmra.mxu1 %vm303_vm3, %v2383_v18  ;;  %1879 = vmatpush3.bf16.msra.mxu0 %v2456_v5  ;;  %v1122_v5 = vshrl.u32 %v2430_v52, 16  ;;  %v489_v18 = vrot.slane %v2387_v21, 1  ;;  %v1137_v44 = vor.u32 %v1136_v41, %v1133_v40  ;;  %v725_v57 = vrot.slane %v723_v29, 2 }
  0x45   : > { %1822 = vmatprep.mubr.msk.bf16.mxu1 %vm2211_vm1, %v2210_v0  ;;  %1840 = vmatprep.mubr.msk.bf16.mxu0 %vm2211_vm1, %v2210_v0  ;;  %v2600_v36 = vsel %vm1241_vm8, %v1245_v55, %v1247_v26  ;;  %v2620_v3 = vsel %vm1241_vm8, %v1247_v26, %v1249_v50 }
  0x46   : > { %1922 = vmatprep.subr.bf16.mxu0 %v2210_v0  ;;  %v1124_v2 = vrot.slane %v1122_v5, 2  ;;  %v490_v43 = vsel %vm483_vm4, %v487_v37, %v489_v18  ;;  %v1251_v37 = vrot.slane %v2505_v16, 3  ;;  %v720_v16 = vshrl.u32 %v1642_v20, 16 }
  0x48   : > { %v1128_v24 = vor.u32 %v1127_v9, %v1124_v2  ;;  %v2631_v52 = vsel %vm1241_vm8, %v1249_v50, %v1251_v37 }
  0x4a   : > { %v2597_v1 = vsel %vm1105_vm7, %v1119_v33, %v1128_v24  ;;  %v2617_v51 = vsel %vm1105_vm7, %v1128_v24, %v1137_v44 }
  0x4b   : > { %1841 = vmatmul.mubr.msk.bf16.gmra.mxu0 %vm303_vm3, %v488_v17 }
  0x4c   : > { %1823 = vmatmul.mubr.msk.bf16.gmra.mxu1 %vm303_vm3, %v2402_v31  ;;  %1844 = vmatprep.mubr.msk.bf16.mxu0 %vm2211_vm1, %v2210_v0  ;;  %v491_v31 = vrot.slane %v2394_v25, 1 }
  0x4d   : > { %1826 = vmatprep.mubr.msk.bf16.mxu1 %vm2211_vm1, %v2210_v0 }
  0x4e   : > { %v492_v11 = vsel %vm483_vm4, %v489_v18, %v491_v31 }
  0x53   : > { %1845 = vmatmul.mubr.msk.bf16.gmra.mxu0 %vm303_vm3, %v490_v43 }
  0x54   : > { %1827 = vmatmul.mubr.msk.bf16.gmra.mxu1 %vm303_vm3, %v2387_v21  ;;  %1848 = vmatprep.mubr.msk.bf16.mxu0 %vm2211_vm1, %v2210_v0  ;;  %v1643_v21 = vcombine.low %v2374_v14, %v2390_v22  ;;  %v494_v14 = vsel %vm483_vm4, %v491_v31, %v493_v30  ;;  %v722_v22 = vrot.slane %v720_v16, 1 }
  0x55   : > { %1830 = vmatprep.mubr.msk.bf16.mxu1 %vm2211_vm1, %v2210_v0 }
  0x56   : > { %v728_v55 = vshrl.u32 %v1643_v21, 16  ;;  %v731_v5 = vshll.u32 %v1643_v21, 16  ;;  %v606_v13 = vrot.slane %v1643_v21, 1  ;;  %v726_v2 = vor.u32 %v725_v57, %v722_v22 }
  0x58   : > { %v730_v35 = vrot.slane %v728_v55, 1  ;;  %v733_v33 = vrot.slane %v731_v5, 2  ;;  %v609_v24 = vsel %vm483_vm4, %v606_v13, %v608_v6  ;;  %v876_v6 = vrot.slane %v1643_v21, 2 }
  0x5a   : > { %v734_v9 = vor.u32 %v733_v33, %v730_v35 }
  0x5b   : > { %1849 = vmatmul.mubr.msk.bf16.gmra.mxu0 %vm303_vm3, %v492_v11 }
  0x5c   : > { %1831 = vmatmul.mubr.msk.bf16.gmra.mxu1 %vm303_vm3, %v2394_v25  ;;  %1852 = vmatprep.mubr.msk.bf16.mxu0 %vm2211_vm1, %v2210_v0  ;;  %v607_v25 = vsel %vm483_vm4, %v605_v12, %v606_v13  ;;  %v735_v17 = vsel %vm718_vm5, %v726_v2, %v734_v9 }
  0x5d   : > { %1858 = vmatprep.mubr.msk.bf16.mxu1 %vm2211_vm1, %v2210_v0 }
  0x63   : > { %1853 = vmatmul.mubr.msk.bf16.gmra.mxu0 %vm303_vm3, %v494_v14 }
  0x64   : > { %1859 = vmatmul.mubr.msk.bf16.vlgmr.msra.gmra.mxu1 %vm303_vm3, %v607_v25  ;;  %1880 = vmatprep.mubr.msk.bf16.mxu0 %vm2211_vm1, %v2210_v0 }
  0x65   : > { %1862 = vmatprep.mubr.msk.bf16.mxu1 %vm2211_vm1, %v2210_v0  ;;  %1901 = vmatpush3.bf16.msra.mxu1 %v2347_v4  ;;  %v744_v4 = vsel %vm718_vm5, %v734_v9, %v2485_v47 }
  0x66   : > { %1944 = vmatprep.subr.bf16.mxu1 %v2210_v0 }
  0x6b   : > { %1881 = vmatmul.mubr.msk.bf16.vlgmr.msra.gmra.mxu0 %vm303_vm3, %v735_v17 }
  0x6c   : > { %1863 = vmatmul.mubr.msk.bf16.gmra.mxu1 %vm303_vm3, %v609_v24  ;;  %1923 = vmatpush3.bf16.msra.mxu0 %v2352_v7  ;;  %v875_v7 = vrot.slane %v1642_v20, 2 }
  0x6d   : > { %1866 = vmatprep.mubr.msk.bf16.mxu1 %vm2211_vm1, %v2210_v0  ;;  %1884 = vmatprep.mubr.msk.bf16.mxu0 %vm2211_vm1, %v2210_v0 }
  0x6e   : > { %1966 = vmatprep.subr.bf16.mxu0 %v2210_v0 }
  0x73   : > { %1885 = vmatmul.mubr.msk.bf16.gmra.mxu0 %vm303_vm3, %v744_v4 }
  0x74   : > { %1867 = vmatmul.mubr.msk.bf16.gmra.mxu1 %vm303_vm3, %v2472_v23  ;;  %1888 = vmatprep.mubr.msk.bf16.mxu0 %vm2211_vm1, %v2210_v0  ;;  %v877_v23 = vsel %vm874_vm6, %v875_v7, %v876_v6 }
  0x75   : > { %1870 = vmatprep.mubr.msk.bf16.mxu1 %vm2211_vm1, %v2210_v0 }
  0x7b   : > { %1889 = vmatmul.mubr.msk.bf16.gmra.mxu0 %vm303_vm3, %v2499_v60 }
  0x7c   : > { %1871 = vmatmul.mubr.msk.bf16.gmra.mxu1 %vm303_vm3, %v2476_v28  ;;  %1892 = vmatprep.mubr.msk.bf16.mxu0 %vm2211_vm1, %v2210_v0  ;;  %v879_v28 = vsel %vm874_vm6, %v876_v6, %v878_v58 }
  0x7d   : > { %1874 = vmatprep.mubr.msk.bf16.mxu1 %vm2211_vm1, %v2210_v0 }
  0x83   : > { %1893 = vmatmul.mubr.msk.bf16.gmra.mxu0 %vm303_vm3, %v2510_v15 }
  0x84   : > { %1875 = vmatmul.mubr.msk.bf16.gmra.mxu1 %vm303_vm3, %v2488_v54  ;;  %1896 = vmatprep.mubr.msk.bf16.mxu0 %vm2211_vm1, %v2210_v0 }
  0x85   : > { %1902 = vmatprep.mubr.msk.bf16.mxu1 %vm2211_vm1, %v2210_v0 }
  0x8b   : > { %1897 = vmatmul.mubr.msk.bf16.gmra.mxu0 %vm303_vm3, %v2527_v27 }
  0x8c   : > { %1903 = vmatmul.mubr.msk.bf16.vlgmr.msra.gmra.mxu1 %vm303_vm3, %v877_v23  ;;  %1924 = vmatprep.mubr.msk.bf16.mxu0 %vm2211_vm1, %v2210_v0 }
  0x8d   : > { %1906 = vmatprep.mubr.msk.bf16.mxu1 %vm2211_vm1, %v2210_v0  ;;  %1945 = vmatpush3.bf16.msra.mxu1 %v2355_v8 }
  0x93   : > { %1925 = vmatmul.mubr.msk.bf16.vlgmr.msra.gmra.mxu0 %vm303_vm3, %v2518_v63 }
  0x94   : > { %1907 = vmatmul.mubr.msk.bf16.gmra.mxu1 %vm303_vm3, %v879_v28  ;;  %1967 = vmatpush3.bf16.msra.mxu0 %v2359_v10 }
  0x95   : > { %1910 = vmatprep.mubr.msk.bf16.mxu1 %vm2211_vm1, %v2210_v0  ;;  %1928 = vmatprep.mubr.msk.bf16.mxu0 %vm2211_vm1, %v2210_v0 }
  0x9b   : > { %1929 = vmatmul.mubr.msk.bf16.gmra.mxu0 %vm303_vm3, %v2530_v32 }
  0x9c   : > { %1911 = vmatmul.mubr.msk.bf16.gmra.mxu1 %vm303_vm3, %v2523_v59  ;;  %1932 = vmatprep.mubr.msk.bf16.mxu0 %vm2211_vm1, %v2210_v0 }
  0x9d   : > { %1914 = vmatprep.mubr.msk.bf16.mxu1 %vm2211_vm1, %v2210_v0 }
  0xa3   : > { %1933 = vmatmul.mubr.msk.bf16.gmra.mxu0 %vm303_vm3, %v2539_v42 }
  0xa4   : > { %1915 = vmatmul.mubr.msk.bf16.gmra.mxu1 %vm303_vm3, %v2534_v39  ;;  %1936 = vmatprep.mubr.msk.bf16.mxu0 %vm2211_vm1, %v2210_v0 }
  0xa5   : > { %1918 = vmatprep.mubr.msk.bf16.mxu1 %vm2211_vm1, %v2210_v0 }
  0xab   : > { %1937 = vmatmul.mubr.msk.bf16.gmra.mxu0 %vm303_vm3, %v2547_v34 }
  0xac   : > { %1919 = vmatmul.mubr.msk.bf16.gmra.mxu1 %vm303_vm3, %v2542_v49  ;;  %1940 = vmatprep.mubr.msk.bf16.mxu0 %vm2211_vm1, %v2210_v0 }
  0xad   : > { %1946 = vmatprep.mubr.msk.bf16.mxu1 %vm2211_vm1, %v2210_v0 }
  0xb3   : > { %1941 = vmatmul.mubr.msk.bf16.gmra.mxu0 %vm303_vm3, %v2550_v48 }
  0xb4   : > { %1947 = vmatmul.mubr.msk.bf16.vlgmr.msra.gmra.mxu1 %vm303_vm3, %v2558_v53  ;;  %1968 = vmatprep.mubr.msk.bf16.mxu0 %vm2211_vm1, %v2210_v0 }
  0xb5   : > { %1950 = vmatprep.mubr.msk.bf16.mxu1 %vm2211_vm1, %v2210_v0 }
  0xbb   : > { %1969 = vmatmul.mubr.msk.bf16.vlgmr.msra.gmra.mxu0 %vm303_vm3, %v2575_v56 }
  0xbc   : > { %1951 = vmatmul.mubr.msk.bf16.gmra.mxu1 %vm303_vm3, %v2581_v45  ;;  %1972 = vmatprep.mubr.msk.bf16.mxu0 %vm2211_vm1, %v2210_v0 }
  0xbd   : > { %1954 = vmatprep.mubr.msk.bf16.mxu1 %vm2211_vm1, %v2210_v0 }
  0xc3   : > { %1973 = vmatmul.mubr.msk.bf16.gmra.mxu0 %vm303_vm3, %v2584_v62 }
  0xc4   : > { %1955 = vmatmul.mubr.msk.bf16.gmra.mxu1 %vm303_vm3, %v2592_v19  ;;  %1976 = vmatprep.mubr.msk.bf16.mxu0 %vm2211_vm1, %v2210_v0 }
  0xc5   : > { %1958 = vmatprep.mubr.msk.bf16.mxu1 %vm2211_vm1, %v2210_v0 }
  0xcb   : > { %1977 = vmatmul.mubr.msk.bf16.gmra.mxu0 %vm303_vm3, %v2600_v36 }
  0xcc   : > { %1959 = vmatmul.mubr.msk.bf16.gmra.mxu1 %vm303_vm3, %v2597_v1  ;;  %1980 = vmatprep.mubr.msk.bf16.mxu0 %vm2211_vm1, %v2210_v0 }
  0xcd   : > { %1962 = vmatprep.mubr.msk.bf16.mxu1 %vm2211_vm1, %v2210_v0 }
  0xd3   : > { %1981 = vmatmul.mubr.msk.bf16.gmra.mxu0 %vm303_vm3, %v2620_v3 }
  0xd4   : > { %1963 = vmatmul.mubr.msk.bf16.gmra.mxu1 %vm303_vm3, %v2617_v51  ;;  %1984 = vmatprep.mubr.msk.bf16.mxu0 %vm2211_vm1, %v2210_v0 }
  0xdb   : > { %1985 = vmatmul.mubr.msk.bf16.gmra.mxu0 %vm303_vm3, %v2631_v52 }
  0xeb   : > { %v357_v8 = vpop.f32.mrf.mxu0 }
  0xec   : > { %v381_v10 = vpop.f32.mrf.mxu1 }
  0xed   : > { %v1794_v61 = vpop.f32.mrf.mxu0 }
  0xee   : > { %v1806_v47 = vpop.f32.mrf.mxu1 }
  0xef   : > { %v360_v54 = vpop.f32.mrf.mxu0 }
  0xf0   : > { %v384_v58 = vpop.f32.mrf.mxu1 }
  0xf1   : > { %v1795_v60 = vpop.f32.mrf.mxu0 }
  0xf2   : > { %v1807_v15 = vpop.f32.mrf.mxu1 }
  0xf3   : > { %v365_v63 = vpop.f32.mrf.mxu0 }
  0xf4   : > { %v389_v59 = vpop.f32.mrf.mxu1 }
  0xf5   : > { %v1798_v27 = vpop.f32.mrf.mxu0 }
  0xf6   : > { %v1810_v32 = vpop.f32.mrf.mxu1 }
  0xf7   : > { %v368_v39 = vpop.f32.mrf.mxu0 }
  0xf8   : > { %v392_v42 = vpop.f32.mrf.mxu1 }
  0xf9   : > { %v1799_v49 = vpop.f32.mrf.mxu0 }
  0xfa   : > { %v1811_v34 = vpop.f32.mrf.mxu1 }
  0xfb   : > { %v373_v0 = vpop.f32.mrf.mxu0 }
  0xfc   : > { %v443_v48 = vpop.f32.mrf.mxu1 }
  0xfd   : > { %v444_v53 = vadd.f32 %v443_v48, %v357_v8  ;;  %v1802_v56 = vpop.f32.mrf.mxu0 }
  0xfe   : > { %v1816_v45 = vpop.f32.mrf.mxu1 }
  0xff   : > { %v376_v62 = vpop.f32.mrf.mxu0 }
 0x100   : > { %v446_v19 = vpop.f32.mrf.mxu1 }
 0x101   : > { %v447_v26 = vadd.f32 %v446_v19, %v360_v54  ;;  %v1803_v1 = vpop.f32.mrf.mxu0 }
 0x102   : > { %v1817_v36 = vpop.f32.mrf.mxu1 }
 0x103   : > { %v547_v18 = vpop.f32.mrf.mxu0 }
 0x104   : > { %v451_v46 = vpop.f32.mrf.mxu1  ;;  %v586_v38 = vadd.f32 %v547_v18, %v444_v53 }
 0x105   : > { %v452_v40 = vadd.f32 %v451_v46, %v365_v63  ;;  %v1838_v41 = vpop.f32.mrf.mxu0 }
 0x106   : > { %v1820_v43 = vpop.f32.mrf.mxu1 }
 0x107   : > { %v550_v44 = vpop.f32.mrf.mxu0 }
 0x108   : > { %v454_v50 = vpop.f32.mrf.mxu1  ;;  %v587_v51 = vadd.f32 %v550_v44, %v447_v26 }
 0x109   : > { %v455_v3 = vadd.f32 %v454_v50, %v368_v39  ;;  %v1839_v31 = vpop.f32.mrf.mxu0 }
 0x10a   : > { %v1821_v37 = vpop.f32.mrf.mxu1 }
 0x10b   : > { %v555_v52 = vpop.f32.mrf.mxu0 }
 0x10c   : > { %v459_v11 = vpop.f32.mrf.mxu1  ;;  %v588_v20 = vadd.f32 %v555_v52, %v452_v40 }
 0x10d   : > { %v460_v21 = vadd.f32 %v459_v11, %v373_v0  ;;  %v1842_v30 = vpop.f32.mrf.mxu0 }
 0x10e   : > { %v1824_v16 = vpop.f32.mrf.mxu1 }
 0x10f   : > { %v558_v29 = vpop.f32.mrf.mxu0 }
 0x110   : > { %v462_v55 = vpop.f32.mrf.mxu1  ;;  %v589_v5 = vadd.f32 %v558_v29, %v455_v3 }
 0x111   : > { %v463_v12 = vadd.f32 %v462_v55, %v376_v62  ;;  %v1843_v13 = vpop.f32.mrf.mxu0 }
 0x112   : > { %v1825_v14 = vpop.f32.mrf.mxu1 }
 0x113   : > { %v563_v22 = vpop.f32.mrf.mxu0 }
 0x114   : > { %v467_v57 = vpop.f32.mrf.mxu1  ;;  %v590_v35 = vadd.f32 %v563_v22, %v460_v21 }
 0x115   : > { %v468_v33 = vadd.f32 %v467_v57, %v381_v10  ;;  %v1846_v25 = vpop.f32.mrf.mxu0 }
 0x116   : > { %v1828_v2 = vpop.f32.mrf.mxu1 }
 0x117   : > { %v566_v9 = vpop.f32.mrf.mxu0 }
 0x118   : > { %v470_v17 = vpop.f32.mrf.mxu1  ;;  %v591_v24 = vadd.f32 %v566_v9, %v463_v12 }
 0x119   : > { %v471_v4 = vadd.f32 %v470_v17, %v384_v58  ;;  %v1847_v7 = vpop.f32.mrf.mxu0 }
 0x11a   : > { %v1829_v6 = vpop.f32.mrf.mxu1 }
 0x11b   : > { %v571_v23 = vpop.f32.mrf.mxu0 }
 0x11c   : > { %v475_v28 = vpop.f32.mrf.mxu1  ;;  %v592_v8 = vadd.f32 %v571_v23, %v468_v33 }
 0x11d   : > { %v476_v61 = vadd.f32 %v475_v28, %v389_v59  ;;  %v1850_v47 = vpop.f32.mrf.mxu0 }
 0x11e   : > { %v1832_v54 = vpop.f32.mrf.mxu1 }
 0x11f   : > { %v574_v60 = vpop.f32.mrf.mxu0 }
 0x120   : > { %v478_v15 = vpop.f32.mrf.mxu1  ;;  %v593_v63 = vadd.f32 %v574_v60, %v471_v4 }
 0x121   : > { %v479_v27 = vadd.f32 %v478_v15, %v392_v42  ;;  %v1851_v32 = vpop.f32.mrf.mxu0 }
 0x122   : > { %v1833_v10 = vpop.f32.mrf.mxu1 }
 0x123   : > { %v579_v39 = vpop.f32.mrf.mxu0 }
 0x124   : > { %v594_v49 = vadd.f32 %v579_v39, %v476_v61  ;;  %v668_v34 = vpop.f32.mrf.mxu1 }
 0x125   : > { %v707_v0 = vadd.f32 %v668_v34, %v586_v38  ;;  %v1854_v48 = vpop.f32.mrf.mxu0 }
 0x126   : > { %v1860_v58 = vpop.f32.mrf.mxu1 }
 0x127   : > { %v582_v53 = vpop.f32.mrf.mxu0 }
 0x128   : > { %v595_v56 = vadd.f32 %v582_v53, %v479_v27  ;;  %v671_v45 = vpop.f32.mrf.mxu1 }
 0x129   : > { %v708_v62 = vadd.f32 %v671_v45, %v587_v51  ;;  %v1855_v19 = vpop.f32.mrf.mxu0 }
 0x12a   : > { %v1861_v59 = vpop.f32.mrf.mxu1 }
 0x12b   : > { %v824_v26 = vpop.f32.mrf.mxu0 }
 0x12c   : > { %v676_v1 = vpop.f32.mrf.mxu1  ;;  %v863_v36 = vadd.f32 %v824_v26, %v707_v0 }
 0x12d   : > { %v709_v18 = vadd.f32 %v676_v1, %v588_v20  ;;  %v1882_v46 = vpop.f32.mrf.mxu0 }
 0x12e   : > { %v1864_v42 = vpop.f32.mrf.mxu1 }
 0x12f   : > { %v827_v40 = vpop.f32.mrf.mxu0 }
 0x130   : > { %v679_v41 = vpop.f32.mrf.mxu1  ;;  %v864_v43 = vadd.f32 %v827_v40, %v708_v62 }
 0x131   : > { %v710_v44 = vadd.f32 %v679_v41, %v589_v5  ;;  %v1883_v50 = vpop.f32.mrf.mxu0 }
 0x132   : > { %v1865_v38 = vpop.f32.mrf.mxu1 }
 0x133   : > { %v832_v3 = vpop.f32.mrf.mxu0 }
 0x134   : > { %v684_v31 = vpop.f32.mrf.mxu1  ;;  %v865_v37 = vadd.f32 %v832_v3, %v709_v18 }
 0x135   : > { %v711_v52 = vadd.f32 %v684_v31, %v590_v35  ;;  %v1886_v11 = vpop.f32.mrf.mxu0 }
 0x136   : > { %v1868_v51 = vpop.f32.mrf.mxu1 }
 0x137   : > { %v835_v21 = vpop.f32.mrf.mxu0 }
 0x138   : > { %v687_v30 = vpop.f32.mrf.mxu1  ;;  %v866_v16 = vadd.f32 %v835_v21, %v710_v44 }
 0x139   : > { %v712_v29 = vadd.f32 %v687_v30, %v591_v24  ;;  %v1887_v55 = vpop.f32.mrf.mxu0 }
 0x13a   : > { %v1869_v20 = vpop.f32.mrf.mxu1 }
 0x13b   : > { %v840_v12 = vpop.f32.mrf.mxu0 }
 0x13c   : > { %v692_v13 = vpop.f32.mrf.mxu1  ;;  %v2777_v14 = vadd.f32 %v840_v12, %v711_v52 }
 0x13d   : > { %v713_v22 = vadd.f32 %v692_v13, %v592_v8  ;;  %v1890_v5 = vpop.f32.mrf.mxu0 }
 0x13e   : > { %v1872_v57 = vpop.f32.mrf.mxu1 }
 0x13f   : > { %v843_v33 = vpop.f32.mrf.mxu0 }
 0x140   : > { %v695_v25 = vpop.f32.mrf.mxu1  ;;  %v2779_v2 = vadd.f32 %v843_v33, %v712_v29 }
 0x141   : > { %v714_v35 = vadd.f32 %v695_v25, %v593_v63  ;;  %v1891_v9 = vpop.f32.mrf.mxu0 }
 0x142   : > { %v1873_v17 = vpop.f32.mrf.mxu1 }
 0x143   : > { %v848_v4 = vpop.f32.mrf.mxu0 }
 0x144   : > { %v700_v7 = vpop.f32.mrf.mxu1  ;;  %v2781_v6 = vadd.f32 %v848_v4, %v713_v22 }
 0x145   : > { %v715_v24 = vadd.f32 %v700_v7, %v594_v49  ;;  %v1894_v23 = vpop.f32.mrf.mxu0 }
 0x146   : > { %v1876_v28 = vpop.f32.mrf.mxu1 }
 0x147   : > { %v851_v61 = vpop.f32.mrf.mxu0 }
 0x148   : > { %v703_v47 = vpop.f32.mrf.mxu1  ;;  %v2783_v54 = vadd.f32 %v851_v61, %v714_v35 }
 0x149   : > { %v716_v8 = vadd.f32 %v703_v47, %v595_v56  ;;  %v1895_v60 = vpop.f32.mrf.mxu0 }
 0x14a   : > { %v1877_v15 = vpop.f32.mrf.mxu1 }
 0x14b   : > { %v856_v27 = vpop.f32.mrf.mxu0 }
 0x14c   : > { %v2785_v32 = vadd.f32 %v856_v27, %v715_v24  ;;  %v938_v63 = vpop.f32.mrf.mxu1 }
 0x14d   : > { %v977_v10 = vadd.f32 %v938_v63, %v863_v36  ;;  %v1898_v39 = vpop.f32.mrf.mxu0 }
 0x14e   : > { %v1904_v34 = vpop.f32.mrf.mxu1 }
 0x14f   : > { %v859_v0 = vpop.f32.mrf.mxu0 }
 0x150   : > { %v2787_v48 = vadd.f32 %v859_v0, %v716_v8  ;;  %v941_v49 = vpop.f32.mrf.mxu1 }
 0x151   : > { %v978_v58 = vadd.f32 %v941_v49, %v864_v43  ;;  %v1899_v53 = vpop.f32.mrf.mxu0 }
 0x152   : > { %v1905_v45 = vpop.f32.mrf.mxu1 }
 0x153   : > { %v1055_v62 = vpop.f32.mrf.mxu0 }
 0x154   : > { %v946_v19 = vpop.f32.mrf.mxu1  ;;  %v1094_v59 = vadd.f32 %v1055_v62, %v977_v10 }
 0x155   : > { %v979_v56 = vadd.f32 %v946_v19, %v865_v37  ;;  %v1926_v26 = vpop.f32.mrf.mxu0 }
 0x156   : > { %v1908_v1 = vpop.f32.mrf.mxu1 }
 0x157   : > { %v1058_v18 = vpop.f32.mrf.mxu0 }
 0x158   : > { %v949_v46 = vpop.f32.mrf.mxu1  ;;  %v1095_v42 = vadd.f32 %v1058_v18, %v978_v58 }
 0x159   : > { %v980_v40 = vadd.f32 %v949_v46, %v866_v16  ;;  %v1927_v36 = vpop.f32.mrf.mxu0 }
 0x15a   : > { %v1909_v41 = vpop.f32.mrf.mxu1 }
 0x15b   : > { %v1063_v44 = vpop.f32.mrf.mxu0 }
 0x15c   : > { %v954_v50 = vpop.f32.mrf.mxu1  ;;  %v1096_v38 = vadd.f32 %v1063_v44, %v979_v56 }
 0x15d   : > { %v1930_v3 = vpop.f32.mrf.mxu0  ;;  %v981_v1 = vadd.f32 %v954_v50, %v2777_v14 }
 0x15e   : > { %v1912_v31 = vpop.f32.mrf.mxu1 }
 0x15f   : > { %v1066_v43 = vpop.f32.mrf.mxu0 }
 0x160   : > { %v957_v52 = vpop.f32.mrf.mxu1  ;;  %v1097_v19 = vadd.f32 %v1066_v43, %v980_v40 }
 0x161   : > { %v1931_v11 = vpop.f32.mrf.mxu0  ;;  %v982_v31 = vadd.f32 %v957_v52, %v2779_v2 }
 0x162   : > { %v1913_v51 = vpop.f32.mrf.mxu1 }
 0x163   : > { %v1071_v21 = vpop.f32.mrf.mxu0 }
 0x164   : > { %v962_v30 = vpop.f32.mrf.mxu1 }
 0x165   : > { %v1934_v37 = vpop.f32.mrf.mxu0  ;;  %v983_v14 = vadd.f32 %v962_v30, %v2781_v6 }
 0x166   : > { %v1916_v29 = vpop.f32.mrf.mxu1 }
 0x167   : > { %v1074_v55 = vpop.f32.mrf.mxu0 }
 0x168   : > { %v965_v20 = vpop.f32.mrf.mxu1  ;;  %v1099_v40 = vadd.f32 %v1074_v55, %v982_v31 }
 0x169   : > { %v1935_v12 = vpop.f32.mrf.mxu0  ;;  %v984_v2 = vadd.f32 %v965_v20, %v2783_v54 }
 0x16a   : > { %v1917_v13 = vpop.f32.mrf.mxu1 }
 0x16b   : > { %v1079_v16 = vpop.f32.mrf.mxu0 }
 0x16c   : > { %v2789_v22 = vpop.f32.mrf.mxu1 }
 0x16d   : > { %v1938_v5 = vpop.f32.mrf.mxu0  ;;  %v985_v6 = vadd.f32 %v2789_v22, %v2785_v32 }
 0x16e   : > { %v1920_v57 = vpop.f32.mrf.mxu1 }
 0x16f   : > { %v1082_v33 = vpop.f32.mrf.mxu0 }
 0x170   : > { %v2791_v25 = vpop.f32.mrf.mxu1  ;;  %v1101_v55 = vadd.f32 %v1082_v33, %v984_v2 }
 0x171   : > { %v1939_v35 = vpop.f32.mrf.mxu0  ;;  %v986_v20 = vadd.f32 %v2791_v25, %v2787_v48 }
 0x172   : > { %v1921_v9 = vpop.f32.mrf.mxu1 }
 0x173   : > { %v1087_v17 = vpop.f32.mrf.mxu0 }
 0x174   : > { %v1191_v4 = vpop.f32.mrf.mxu1 }
 0x175   : > { %v1942_v7 = vpop.f32.mrf.mxu0  ;;  %v1230_v47 = vadd.f32 %v1191_v4, %v1094_v59 }
 0x176   : > { %v1948_v24 = vpop.f32.mrf.mxu1 }
 0x177   : > { %v2793_v23 = vpop.f32.mrf.mxu0 }
 0x178   : > { %v1194_v28 = vpop.f32.mrf.mxu1 }
 0x179   : > { %v1943_v61 = vpop.f32.mrf.mxu0  ;;  %v1231_v10 = vadd.f32 %v1194_v28, %v1095_v42  ;;  %v1098_v42 = vadd.f32 %v1071_v21, %v981_v1  ;;  %v1100_v21 = vadd.f32 %v1079_v16, %v983_v14 }
 0x17a   : > { %v1949_v8 = vpop.f32.mrf.mxu1 }
 0x17b   : > { %v1305_v60 = vpop.f32.mrf.mxu0 }
 0x17c   : > { %v1199_v15 = vpop.f32.mrf.mxu1  ;;  %v2795_v27 = vadd.f32 %v1305_v60, %v1230_v47  ;;  %v1102_v47 = vadd.f32 %v1087_v17, %v985_v6 }
 0x17d   : > { %v1970_v63 = vpop.f32.mrf.mxu0  ;;  %v1232_v53 = vadd.f32 %v1199_v15, %v1096_v38 }
 0x17e   : > { %v1952_v39 = vpop.f32.mrf.mxu1 }
 0x17f   : > { %v1308_v34 = vpop.f32.mrf.mxu0 }
 0x180   : > { %v1202_v0 = vpop.f32.mrf.mxu1  ;;  %v2797_v49 = vadd.f32 %v1308_v34, %v1231_v10  ;;  %v1103_v10 = vadd.f32 %v2793_v23, %v986_v20 }
 0x181   : > { %v1971_v58 = vpop.f32.mrf.mxu0  ;;  %v1233_v18 = vadd.f32 %v1202_v0, %v1097_v19 }
 0x182   : > { %v1953_v45 = vpop.f32.mrf.mxu1 }
 0x183   : > { %v1313_v62 = vpop.f32.mrf.mxu0 }
 0x184   : > { %v1207_v56 = vpop.f32.mrf.mxu1  ;;  %v2799_v26 = vadd.f32 %v1313_v62, %v1232_v53 }
 0x185   : > { %v1974_v59 = vpop.f32.mrf.mxu0  ;;  %v1234_v38 = vadd.f32 %v1207_v56, %v1098_v42 }
 0x186   : > { %v1956_v46 = vpop.f32.mrf.mxu1 }
 0x187   : > { %v1316_v36 = vpop.f32.mrf.mxu0 }
 0x188   : > { %v1210_v41 = vpop.f32.mrf.mxu1  ;;  %v2802_v44 = vadd.f32 %v1316_v36, %v1233_v18 }
 0x189   : > { %v1975_v3 = vpop.f32.mrf.mxu0  ;;  %v1235_v50 = vadd.f32 %v1210_v41, %v1099_v40 }
 0x18a   : > { %v1957_v11 = vpop.f32.mrf.mxu1 }
 0x18b   : > { %v1321_v51 = vpop.f32.mrf.mxu0 }
 0x18c   : > { %v1215_v43 = vpop.f32.mrf.mxu1  ;;  %v2805_v37 = vadd.f32 %v1321_v51, %v1234_v38 }
 0x18d   : > { %v1978_v29 = vpop.f32.mrf.mxu0  ;;  %v1236_v52 = vadd.f32 %v1215_v43, %v1100_v21 }
 0x18e   : > { %v1960_v12 = vpop.f32.mrf.mxu1 }
 0x18f   : > { %v1324_v13 = vpop.f32.mrf.mxu0 }
 0x190   : > { %v1218_v5 = vpop.f32.mrf.mxu1  ;;  %v2808_v57 = vadd.f32 %v1324_v13, %v1235_v50 }
 0x191   : > { %v1979_v35 = vpop.f32.mrf.mxu0  ;;  %v1237_v30 = vadd.f32 %v1218_v5, %v1101_v55 }
 0x192   : > { %v1961_v9 = vpop.f32.mrf.mxu1 }
 0x193   : > { %v1329_v4 = vpop.f32.mrf.mxu0 }
 0x194   : > { %v1223_v7 = vpop.f32.mrf.mxu1  ;;  %v2811_v24 = vadd.f32 %v1329_v4, %v1236_v52 }
 0x195   : > { %v1982_v28 = vpop.f32.mrf.mxu0  ;;  %v1238_v33 = vadd.f32 %v1223_v7, %v1102_v47 }
 0x196   : > { %v1964_v61 = vpop.f32.mrf.mxu1 }
 0x197   : > { %v1332_v16 = vpop.f32.mrf.mxu0 }
 0x198   : > { %v1226_v8 = vpop.f32.mrf.mxu1  ;;  %v2815_v60 = vadd.f32 %v1332_v16, %v1237_v30 }
 0x199   : > { %v1983_v54 = vpop.f32.mrf.mxu0  ;;  %v1239_v22 = vadd.f32 %v1226_v8, %v1103_v10 }
 0x19a   : > { %v1965_v15 = vpop.f32.mrf.mxu1 }
 0x19b   : > { %v1337_v63 = vpop.f32.mrf.mxu0 }
 0x19c   : > { %v2820_v39 = vadd.f32 %v1337_v63, %v1238_v33 }
 0x19d   : > { %v1986_v32 = vpop.f32.mrf.mxu0  ;;  %1357 = sbr.rel (%p1680_p1) target bundleno = 423 (0x1a7), region = 36 }
 0x19f   : > { %v1340_v34 = vpop.f32.mrf.mxu0 }
 0x1a0   : > { %v2822_v0 = vadd.f32 %v1340_v34, %v1239_v22 }
 0x1a1   : > { %v1987_v17 = vpop.f32.mrf.mxu0 }
 0x1a2   : > { %1358 = vst [vmem:[#allocation2 + $0x30] sm:$0xff] %v2795_v27  ;;  %1359 = vst [vmem:[#allocation2] sm:$0xff] %v2797_v49 }
 0x1a3   : > { %1360 = vst [vmem:[#allocation2 + $0x18] sm:$0xff] %v2799_v26  ;;  %1361 = vst [vmem:[#allocation2 + $0x10] sm:$0xff] %v2802_v44 }
 0x1a4   : > { %1362 = vst [vmem:[#allocation2 + $0x48] sm:$0xff] %v2805_v37  ;;  %1363 = vst [vmem:[#allocation2 + $0x28] sm:$0xff] %v2808_v57 }
 0x1a5   : > { %1364 = vst [vmem:[#allocation2 + $0x8] sm:$0xff] %v2811_v24  ;;  %1365 = vst [vmem:[#allocation2 + $0x20] sm:$0xff] %v2815_v60 }
 0x1a6   : > { %1366 = vst [vmem:[#allocation2 + $0x40] sm:$0xff] %v2820_v39  ;;  %1367 = vst [vmem:[#allocation2 + $0x38] sm:$0xff] %v2822_v0 }
 0x1a7 PF: > { %p1368_p2 = scmp.gt.s32.totalorder %s2184_s15, 0  ;;  %p1369_p3 = scmp.lt.s32.totalorder %s2184_s15, 2 }
 0x1a9   : > { %p1370_p4 = pnand %p1369_p3, %p1368_p2 }
 0x1ab   : > { %1373 = sbr.rel (%p1370_p4) target bundleno = 440 (0x1b8), region = 40 }
 0x1b0   : > { %v1374_v48 = vld [vmem:[#allocation2 + $0x30] sm:$0xff]  ;;  %v1375_v25 = vld [vmem:[#allocation2] sm:$0xff]  ;;  %v1376_v23 = vld [vmem:[#allocation2 + $0x18] sm:$0xff] }
 0x1b1   : > { %v1384_v58 = vadd.f32 %v1374_v48, %v2795_v27  ;;  %v1385_v53 = vadd.f32 %v1375_v25, %v2797_v49  ;;  %v1386_v45 = vadd.f32 %v1376_v23, %v2799_v26  ;;  %v1377_v62 = vld [vmem:[#allocation2 + $0x10] sm:$0xff]  ;;  %v1378_v19 = vld [vmem:[#allocation2 + $0x48] sm:$0xff]  ;;  %v1381_v36 = vld [vmem:[#allocation2 + $0x20] sm:$0xff] }
 0x1b2   : > { %v1379_v56 = vld [vmem:[#allocation2 + $0x28] sm:$0xff]  ;;  %v1387_v59 = vadd.f32 %v1377_v62, %v2802_v44  ;;  %v1388_v1 = vadd.f32 %v1378_v19, %v2805_v37  ;;  %v1382_v42 = vld [vmem:[#allocation2 + $0x40] sm:$0xff]  ;;  %v1391_v3 = vadd.f32 %v1381_v36, %v2815_v60  ;;  %v1383_v38 = vld [vmem:[#allocation2 + $0x38] sm:$0xff] }
 0x1b3   : > { %v1389_v18 = vadd.f32 %v1379_v56, %v2808_v57  ;;  %v1380_v46 = vld [vmem:[#allocation2 + $0x8] sm:$0xff]  ;;  %1394 = vst [vmem:[#allocation2 + $0x30] sm:$0xff] %v1384_v58  ;;  %1395 = vst [vmem:[#allocation2] sm:$0xff] %v1385_v53  ;;  %v1392_v31 = vadd.f32 %v1382_v42, %v2820_v39  ;;  %v1393_v11 = vadd.f32 %v1383_v38, %v2822_v0 }
 0x1b4   : > { %1396 = vst [vmem:[#allocation2 + $0x18] sm:$0xff] %v1386_v45  ;;  %v1390_v41 = vadd.f32 %v1380_v46, %v2811_v24  ;;  %1397 = vst [vmem:[#allocation2 + $0x10] sm:$0xff] %v1387_v59 }
 0x1b5   : > { %1398 = vst [vmem:[#allocation2 + $0x48] sm:$0xff] %v1388_v1  ;;  %1399 = vst [vmem:[#allocation2 + $0x28] sm:$0xff] %v1389_v18 }
 0x1b6   : > { %1400 = vst [vmem:[#allocation2 + $0x8] sm:$0xff] %v1390_v41  ;;  %1401 = vst [vmem:[#allocation2 + $0x20] sm:$0xff] %v1391_v3 }
 0x1b7   : > { %1402 = vst [vmem:[#allocation2 + $0x40] sm:$0xff] %v1392_v31  ;;  %1403 = vst [vmem:[#allocation2 + $0x38] sm:$0xff] %v1393_v11 }
 0x1b8 PF: > { %p1681_p5 = scmp.ne.s32.totalorder %s2184_s15, 2 }
 0x1ba   : > { %1407 = sbr.rel (%p1681_p5) target bundleno = 463 (0x1cf), region = 44 }
 0x1bf   : > { %v1408_v51 = vld [vmem:[#allocation2 + $0x30] sm:$0xff]  ;;  %v1409_v40 = vld [vmem:[#allocation2] sm:$0xff]  ;;  %v1410_v50 = vld [vmem:[#allocation2 + $0x18] sm:$0xff] }
 0x1c0   : > { %v1682_v43 = vld [vmem:[%s2940_s2] ss:$0 sm:$0xff]  ;;  %v1418_v29 = vadd.f32 %v1408_v51, %v2795_v27  ;;  %v1419_v14 = vadd.f32 %v1409_v40, %v2797_v49  ;;  %v1411_v12 = vld [vmem:[#allocation2 + $0x10] sm:$0xff]  ;;  %v1412_v13 = vld [vmem:[#allocation2 + $0x48] sm:$0xff]  ;;  %v1420_v21 = vadd.f32 %v1410_v50, %v2799_v26 }
 0x1c1   : > { %v1421_v5 = vadd.f32 %v1411_v12, %v2802_v44  ;;  %v1413_v35 = vld [vmem:[#allocation2 + $0x28] sm:$0xff]  ;;  %v1422_v2 = vadd.f32 %v1412_v13, %v2805_v37  ;;  %v1415_v9 = vld [vmem:[#allocation2 + $0x20] sm:$0xff]  ;;  %v1417_v37 = vld [vmem:[#allocation2 + $0x38] sm:$0xff] }
 0x1c2   : > { %v1414_v52 = vld [vmem:[#allocation2 + $0x8] sm:$0xff]  ;;  %v1435_v4 = vadd.f32 %v1682_v43, %v1418_v29  ;;  %v1436_v55 = vadd.f32 %v1682_v43, %v1419_v14  ;;  %v1423_v7 = vadd.f32 %v1413_v35, %v2808_v57  ;;  %v1437_v28 = vadd.f32 %v1682_v43, %v1420_v21  ;;  %v1416_v61 = vld [vmem:[#allocation2 + $0x40] sm:$0xff] }
 0x1c3   : > { %v1424_v27 = vadd.f32 %v1414_v52, %v2811_v24  ;;  %v1438_v49 = vadd.f32 %v1682_v43, %v1421_v5  ;;  %v1439_v6 = vadd.f32 %v1682_v43, %v1422_v2  ;;  %v1425_v30 = vadd.f32 %v1415_v9, %v2815_v60 }
 0x1c4   : > { %v1445_v26 = vmax.f32 %v1435_v4, 0.0  ;;  %v1446_v44 = vmax.f32 %v1436_v55, 0.0  ;;  %v1440_v16 = vadd.f32 %v1682_v43, %v1423_v7  ;;  %v1447_v8 = vmax.f32 %v1437_v28, 0.0 }
 0x1c5   : > { %v1441_v47 = vadd.f32 %v1682_v43, %v1424_v27  ;;  %v1448_v54 = vmax.f32 %v1438_v49, 0.0  ;;  %v1449_v20 = vmax.f32 %v1439_v6, 0.0  ;;  %v1442_v57 = vadd.f32 %v1682_v43, %v1425_v30 }
 0x1c6   : > { %v1710_v24 = vpack.c.bf16 %v1446_v44, %v1445_v26  ;;  %v1450_v33 = vmax.f32 %v1440_v16, 0.0  ;;  %v1426_v60 = vadd.f32 %v1416_v61, %v2820_v39  ;;  %v1427_v32 = vadd.f32 %v1417_v37, %v2822_v0 }
 0x1c7   : > { %v1451_v15 = vmax.f32 %v1441_v47, 0.0  ;;  %v1715_v63 = vpack.c.bf16 %v1448_v54, %v1447_v8  ;;  %v1452_v10 = vmax.f32 %v1442_v57, 0.0 }
 0x1c8   : > { %1711 = vst [vmem:[%s2825_s23] sm:$0xff] %v1710_v24   ;;  %v1720_v22 = vpack.c.bf16 %v1450_v33, %v1449_v20  ;;  %v1443_v34 = vadd.f32 %v1682_v43, %v1426_v60  ;;  %v1444_v48 = vadd.f32 %v1682_v43, %v1427_v32 }
 0x1c9   : > { %1732 = vst [vmem:[%s2825_s23 + $0x8] sm:$0xff] %v1715_v63   ;;  %v1725_v17 = vpack.c.bf16 %v1452_v10, %v1451_v15 }
 0x1ca   : > { %1733 = vst [vmem:[%s2825_s23 + $0x10] sm:$0xff] %v1720_v22   ;;  %v1453_v25 = vmax.f32 %v1443_v34, 0.0  ;;  %v1454_v23 = vmax.f32 %v1444_v48, 0.0 }
 0x1cb   : > { %1734 = vst [vmem:[%s2825_s23 + $0x18] sm:$0xff] %v1725_v17  }
 0x1cc   : > { %v1730_v58 = vpack.c.bf16 %v1454_v23, %v1453_v25 }
 0x1ce   : > { %1735 = vst [vmem:[%s2825_s23 + $0x20] sm:$0xff] %v1730_v58  }
 0x1cf PF: > { %s1993_s15 = smul.u32 10, %s2188_s16  ;;  %s1521_s4 = sshll.u32 %s2825_s23, 4  ;;  %s2872_s4 = int_to_ptr.vmem [resolvable:$true] %s1521_s4 }
 0x1d0   : > { %s1994_s30 = smul.u32 80, %s2192_s17  ;;  %s2881_s9 = scalar_lea.sflag [#allocation4], %s197_s7 }
 0x1d1   : > { %s2100_s29 = scalar_lea.vmem %s2872_s4, 640  ;;  %s2212_s16 = smov [#allocation3]  }
 0x1d2   : > { %s1518_s5 = sadd.s32 %s1994_s30, %s1993_s15  ;;  %p2101_p8 = scmp.ne.s32.totalorder %s2872_s4, %s2100_s29 }
 0x1d3   : > { %s1693_s8 = sshll.u32 %s1518_s5, 6  ;;  %s2104_s17 = sshll.u32 %s2212_s16, 4  ;;  %s2105_s17 = int_to_ptr.vmem [resolvable:$false] %s2104_s17 }
 0x1d4   : > { %s2877_s10 = scalar_lea.hbm %s2941_s3, %s1693_s8  ;;  %p2102_p9 = pnand %p2101_p8, %p2297_p6 }
 0x1d5   : > { %s2106_s23 = scalar_lea.vmem %s2105_s17, 1280  ;;  %p2107_p11 = scmp.lt.s32.totalorder %s2872_s4, %s2105_s17 }
 0x1d6   : > { %p2103_p10 = pneg %p2102_p9  ;;  %p2108_p12 = scmp.lt.s32.totalorder %s2106_s23, %s2100_s29 }
 0x1d8   : > { %p2109_p13 = por %p2108_p12, %p2107_p11 }
 0x1da   : > { %p2110_p0 = pnand %p2109_p13, %p2103_p10 }
 0x1dc   : > { %2113 = shalt.err (!%p2110_p0)
}
 0x1dd   : > { %s2114_s7 = scalar_lea.hbm %s2877_s10, 640  ;;  %s2118_s5 = scalar_lea.hbm %s2941_s3, 10240 }
 0x1de   : > { %p2115_p1 = scmp.ne.s32.totalorder %s2877_s10, %s2114_s7  ;;  %p2119_p4 = scmp.lt.s32.totalorder %s2877_s10, %s2941_s3 }
 0x1df   : > { %p2120_p5 = scmp.lt.s32.totalorder %s2118_s5, %s2114_s7 }
 0x1e0   : > { %p2116_p2 = pnand %p2115_p1, %p2297_p6 }
 0x1e1   : > { %p2121_p8 = por %p2120_p5, %p2119_p4 }
 0x1e2   : > { %p2117_p3 = pneg %p2116_p2 }
 0x1e4   : > { %p2122_p9 = pnand %p2121_p8, %p2117_p3 }
 0x1e6   : > { %2125 = shalt.err (!%p2122_p9)
}
 0x1e7   : > { %s2213_s22 = smov 64   ;;  %s2214_s29 = smov 4  }
 0x1e8   : > { %1995 = dma.vmem_to_hbm [thread:$0]  (%p2297_p6), %s2872_s4, 640, %s2877_s10, %s2881_s9, %s2213_s22, %s2213_s22, %s2214_s29  }
 0x1e9 PF: > { %p2001_p10 = scmp.ge.s32.totalorder %s2208_s21, 2  ;;  %s1536_s16 = sand.u32 1, %s2172_s12  }
 0x1ea   : > { %s1537_s17 = scalar_lea.sflag [#allocation4], %s1536_s16 }
 0x1eb   : > { %p1998_p11 = pnand %p2001_p10, %p2304_p7 }
 0x1ed   : > { %p1999_p12 = pneg %p1998_p11 }
 0x1ef   : > { %2167 = dma.done.wait (%p1999_p12), %s1537_s17, 640  }
 0x1f0   : > { %2169 = vsyncadd (%p1999_p12), %s1537_s17, 4294966656  ;;  %s16_s21 = sadd.s32 1, %s2208_s21   ;;  %s2944_s12 = smov %s2176_s13 }
 0x1f1   : > { %p13_p13 = scmp.ge.s32.totalorder %s16_s21, 50   ;;  %s2945_s13 = smov %s2180_s14 }
 0x1f2   : > { %s2946_s14 = smov %s2318_s6  ;;  %s2947_s15 = smov %s2196_s18 }
 0x1f3   : > { %s2948_s16 = smov %s2200_s19  ;;  %s2949_s17 = smov %s2204_s20 }
 0x1f4   : > { %s2950_s18 = smov %s2954_s24  ;;  %s2951_s19 = smov %s2958_s25 }
 0x1f5   : > { %s2952_s20 = smov %s2962_s26  ;;  %15 = sbr.rel (!%p13_p13) target bundleno = 6 (0x6), region = 80 }
 0x1fa   :  { %1542 = vsyncpa [#allocation4], 1 }
 0x1fb   :  { %1544 = vsyncpa [#allocation4 + $0x1], 1 }

</bundles_post_ra>
